<compile_context>
chip_gen: v5e
topology: v5e:2x2
jax: 0.10.0
libtpu: 0.0.40
codegen_flags: <defaults>
</compile_context>

<pallas_src>
import functools

import jax
import jax.numpy as jnp
from jax import lax
from jax.experimental import pallas as pl
from jax.experimental.pallas import tpu as pltpu


def _linear_attention_kernel(x_ref, wqkv_ref, wout_ref, bout_ref, o_ref,
                             *, scale, n_valid, heads, dim_head):
    # x_ref:    (C, Np)        flattened (+ optionally lane-padded) NCHW input
    # wqkv_ref: (3*hidden, C)  to_qkv 1x1-conv weight, row = s*hidden + h*d + c
    # wout_ref: (C, hidden)    to_out 1x1-conv weight, col = h*d + c
    # bout_ref: (C, 1)         to_out bias
    # o_ref:    (C, Np)        output block
    hidden = heads * dim_head

    x = x_ref[...]                      # native dtype -> MXU (bf16-native on v6e/v7x)
    cdt = x.dtype                       # MXU operand dtype
    np_lanes = x.shape[-1]

    # Fused qkv projection for ALL heads: (3*hidden, C) @ (C, Np), f32 accumulation.
    qkv = jnp.dot(wqkv_ref[...], x, preferred_element_type=jnp.float32)
    q = qkv[:hidden]                    # (hidden, Np)
    k = qkv[hidden:2 * hidden]
    v = qkv[2 * hidden:]

    if n_valid < np_lanes:
        # Spatial axis was lane-padded in the wrapper; keep padded lanes out of
        # the softmax.  (1, Np) iota, broadcast by jnp.where.
        lane = lax.broadcasted_iota(jnp.int32, (1, np_lanes), 1)
        k = jnp.where(lane < n_valid, k, -1e30)

    # Row-wise softmax over the spatial axis, all heads at once (f32 math).
    m = jnp.max(k, axis=-1, keepdims=True)            # (hidden, 1)
    p = jnp.exp(k - m)                                 # EUP
    z = jnp.sum(p, axis=-1, keepdims=True)             # (hidden, 1)
    coef = scale * pl.reciprocal(z, approx=True)       # fold 1/z and q-scale

    p = p.astype(cdt)
    v = v.astype(cdt)
    q = q.astype(cdt)

    # Only the tiny (d, Np)x(Np, d) / (d, d)x(d, Np) context matmuls are
    # per-head; statically unrolled Python loop over heads.
    outs = []
    for h in range(heads):
        sl = slice(h * dim_head, (h + 1) * dim_head)
        # ctx[d, e] = sum_n softmax(k)[d, n] * v[e, n]
        ctx = lax.dot_general(p[sl], v[sl], (((1,), (1,)), ((), ())),
                              preferred_element_type=jnp.float32)      # (d, d)
        ctx = (ctx * coef[sl]).astype(cdt)              # fold scale / z here
        # out[e, n] = sum_d ctx[d, e] * q[d, n]
        out_h = jnp.dot(ctx.T, q[sl], preferred_element_type=jnp.float32)
        outs.append(out_h)
    out_all = jnp.concatenate(outs, axis=0)             # (hidden, Np), f32

    # to_out 1x1 conv: ONE matmul with K = hidden (=128), plus bias.
    y = jnp.dot(wout_ref[...], out_all.astype(cdt),
                preferred_element_type=jnp.float32)
    y = y + bout_ref[...].astype(jnp.float32)
    o_ref[...] = y.astype(o_ref.dtype)


def linear_attention(x, w_qkv, w_out, b_out, *, heads=4, dim_head=32):
    """LinearAttention.forward.

    x:      (B, C, H, W)              NCHW input
    w_qkv:  (3 * heads*dim_head, C)   to_qkv 1x1-conv weight (no bias)
    w_out:  (C, heads*dim_head)       to_out 1x1-conv weight
    b_out:  (C,)                      to_out bias
    """
    B, C, H, W = x.shape
    hidden = heads * dim_head
    assert w_qkv.shape == (3 * hidden, C)
    assert w_out.shape == (C, hidden)
    assert b_out.shape == (C,)

    N = H * W
    Np = ((N + 127) // 128) * 128          # lane-dense loads/stores
    scale = float(dim_head) ** -0.5

    xr = x.reshape(B, C, N)
    if Np != N:
        # TODO(synk): for non-128-multiple H*W this pad (and the slice below)
        # costs an extra HBM pass over the activations; for large N replace
        # with in-kernel spatial tiling + ragged-last-tile masking.
        xr = jnp.pad(xr, ((0, 0), (0, 0), (0, Np - N)))

    bout = b_out.reshape(C, 1)

    itemsize = jnp.dtype(x.dtype).itemsize
    # VMEM budget derived per call (scales down for v7x's 64 MiB VMEM, up for
    # big tiles): double-buffered x/out blocks + weights + f32 intermediates
    # (qkv slab, p, per-head outs, y), with ~2x headroom.
    io_bytes = 2 * 2 * C * Np * itemsize
    weight_bytes = 2 * (3 * hidden * C + C * hidden + C) * itemsize
    interm_bytes = (3 * hidden + 2 * hidden + 2 * C) * Np * 4
    vmem_limit = int(min(max(2 * (io_bytes + weight_bytes + interm_bytes),
                             32 * 1024 * 1024), 128 * 1024 * 1024))

    flops_per_b = (2 * (3 * hidden) * C * Np                 # qkv projection
                   + 4 * heads * dim_head * dim_head * Np    # context matmuls
                   + 2 * C * hidden * Np                     # to_out projection
                   + 4 * hidden * Np)                        # softmax elementwise
    cost = pl.CostEstimate(
        flops=int(B * flops_per_b),
        transcendentals=int(B * hidden * Np),
        bytes_accessed=int(2 * B * C * Np * itemsize
                           + (3 * hidden * C + C * hidden + C) * itemsize))

    # TODO(synk): on v7x (2 TensorCores) with very small B, add a second
    # independent parallel grid axis (e.g. head-groups) so both cores stay fed.
    out = pl.pallas_call(
        functools.partial(_linear_attention_kernel, scale=scale, n_valid=N,
                          heads=heads, dim_head=dim_head),
        out_shape=jax.ShapeDtypeStruct((B, C, Np), x.dtype),
        grid=(B,),
        in_specs=[
            pl.BlockSpec((None, C, Np), lambda b: (b, 0, 0)),
            pl.BlockSpec((3 * hidden, C), lambda b: (0, 0)),
            pl.BlockSpec((C, hidden), lambda b: (0, 0)),
            pl.BlockSpec((C, 1), lambda b: (0, 0)),
        ],
        out_specs=pl.BlockSpec((None, C, Np), lambda b: (b, 0, 0)),
        compiler_params=pltpu.CompilerParams(
            dimension_semantics=("parallel",),
            vmem_limit_bytes=vmem_limit),
        cost_estimate=cost,
    )(xr, w_qkv, w_out, bout)

    if Np != N:
        out = out[:, :, :N]
    return out.reshape(B, C, H, W)


def _linear_attention_ref(x, w_qkv, w_out, b_out, heads, dim_head):
    """Pure-JAX reference matching the PyTorch module."""
    B, C, H, W = x.shape
    hidden = heads * dim_head
    N = H * W
    scale = float(dim_head) ** -0.5

    xf = x.reshape(B, C, N).astype(jnp.float32)
    qkv = jnp.einsum('oc,bcn->bon', w_qkv.astype(jnp.float32), xf)
    q, k, v = jnp.split(qkv, 3, axis=1)

    def to_heads(t):
        return t.reshape(B, heads, dim_head, N)

    q = to_heads(q) * scale
    k = jax.nn.softmax(to_heads(k), axis=-1)
    v = to_heads(v)

    context = jnp.einsum('bhdn,bhen->bhde', k, v)
    out = jnp.einsum('bhde,bhdn->bhen', context, q)
    out = out.reshape(B, hidden, N)
    y = jnp.einsum('ch,bhn->bcn', w_out.astype(jnp.float32), out) \
        + b_out.astype(jnp.float32).reshape(1, C, 1)
    return y.reshape(B, C, H, W).astype(x.dtype)


if __name__ == "__main__":
    B, C = 2, 4                    # dim = 4
    heads, dim_head = 4, 32        # hidden = 128
    hidden = heads * dim_head

    key = jax.random.PRNGKey(0)
    k0, k1, k2, k3, k4 = jax.random.split(key, 5)

    w_qkv = jax.random.normal(k1, (3 * hidden, C), jnp.float32) / (C ** 0.5)
    w_out = jax.random.normal(k2, (C, hidden), jnp.float32) / (hidden ** 0.5)
    b_out = jax.random.normal(k3, (C,), jnp.float32) * 0.1

    # Case 1: H*W already a multiple of 128 (lane-dense, no padding).
    H, W = 16, 16
    x = jax.random.normal(k0, (B, C, H, W), jnp.float32)
    out = jax.block_until_ready(
        linear_attention(x, w_qkv, w_out, b_out, heads=heads, dim_head=dim_head))
    ref = _linear_attention_ref(x, w_qkv, w_out, b_out, heads, dim_head)
    assert out.shape == (B, C, H, W)
    assert jnp.allclose(out, ref, atol=2e-2, rtol=2e-2), \
        float(jnp.max(jnp.abs(out - ref)))

    # Case 2: H*W not a multiple of 128 -> exercises the pad + softmax-mask path.
    H2, W2 = 9, 9
    x2 = jax.random.normal(k4, (B, C, H2, W2), jnp.float32)
    out2 = jax.block_until_ready(
        linear_attention(x2, w_qkv, w_out, b_out, heads=heads, dim_head=dim_head))
    ref2 = _linear_attention_ref(x2, w_qkv, w_out, b_out, heads, dim_head)
    assert out2.shape == (B, C, H2, W2)
    assert jnp.allclose(out2, ref2, atol=2e-2, rtol=2e-2), \
        float(jnp.max(jnp.abs(out2 - ref2)))

    print("KERNEL_OK")
</pallas_src>

<mosaic_0001>
module attributes {stable_mosaic.version = 11 : i64} {
  func.func @_linear_attention_kernel(%arg0: i32, %arg1: memref<1x4x256xf32, #tpu.memory_space<vmem>>, %arg2: memref<384x4xf32, #tpu.memory_space<vmem>>, %arg3: memref<4x128xf32, #tpu.memory_space<vmem>>, %arg4: memref<4x1xf32, #tpu.memory_space<vmem>>, %arg5: memref<1x4x256xf32, #tpu.memory_space<vmem>>) attributes {dimension_semantics = [#tpu.dimension_semantics<parallel>], iteration_bounds = array<i64: 2>, scalar_prefetch = 0 : i64, scratch_operands = 0 : i64, tpu.core_type = #tpu.core_type<tc>, window_params = [{transform_indices = @transform_0, window_bounds = array<i64: 1, 4, 256>}, {pipeline_mode = #tpu.pipeline_mode<synchronous>, transform_indices = @transform_1, window_bounds = array<i64: 384, 4>}, {pipeline_mode = #tpu.pipeline_mode<synchronous>, transform_indices = @transform_2, window_bounds = array<i64: 4, 128>}, {pipeline_mode = #tpu.pipeline_mode<synchronous>, transform_indices = @transform_3, window_bounds = array<i64: 4, 1>}, {transform_indices = @transform_4, window_bounds = array<i64: 1, 4, 256>}]} {
    %c0 = arith.constant 0 : index
    %c0_0 = arith.constant 0 : index
    %c0_1 = arith.constant 0 : index
    %0 = vector.load %arg1[%c0, %c0_0, %c0_1] : memref<1x4x256xf32, #tpu.memory_space<vmem>>, vector<1x4x256xf32>
    %1 = vector.shape_cast %0 : vector<1x4x256xf32> to vector<4x256xf32>
    %c0_2 = arith.constant 0 : index
    %c0_3 = arith.constant 0 : index
    %2 = vector.load %arg2[%c0_2, %c0_3] : memref<384x4xf32, #tpu.memory_space<vmem>>, vector<384x4xf32>
    %cst = arith.constant dense<0.000000e+00> : vector<384x256xf32>
    %3 = tpu.matmul %2, %1, %cst {dimension_numbers = #tpu.dot_dimension_numbers<[1], [0], [0], [1], [0, 0, 1, 1], [], []>} : vector<384x4xf32>, vector<4x256xf32>, vector<384x256xf32> -> vector<384x256xf32>
    %4 = vector.extract_strided_slice %3 {offsets = [0, 0], sizes = [128, 256], strides = [1, 1]} : vector<384x256xf32> to vector<128x256xf32>
    %5 = vector.extract_strided_slice %3 {offsets = [128, 0], sizes = [128, 256], strides = [1, 1]} : vector<384x256xf32> to vector<128x256xf32>
    %6 = vector.extract_strided_slice %3 {offsets = [256, 0], sizes = [128, 256], strides = [1, 1]} : vector<384x256xf32> to vector<128x256xf32>
    %cst_4 = arith.constant dense<0xFF800000> : vector<128xf32>
    %7 = vector.multi_reduction <maximumf>, %5, %cst_4 [1] : vector<128x256xf32> to vector<128xf32>
    %8 = vector.shape_cast %7 : vector<128xf32> to vector<128x1xf32>
    %9 = vector.broadcast %8 : vector<128x1xf32> to vector<128x256xf32>
    %10 = arith.subf %5, %9 : vector<128x256xf32>
    %11 = math.exp %10 : vector<128x256xf32>
    %cst_5 = arith.constant dense<0.000000e+00> : vector<128xf32>
    %12 = vector.multi_reduction <add>, %11, %cst_5 [1] : vector<128x256xf32> to vector<128xf32>
    %13 = vector.shape_cast %12 : vector<128xf32> to vector<128x1xf32>
    %14 = tpu.reciprocal %13 {approx = true} : vector<128x1xf32> -> vector<128x1xf32>
    %cst_6 = arith.constant 0.176776692 : f32
    %15 = vector.broadcast %cst_6 : f32 to vector<128x1xf32>
    %16 = arith.mulf %15, %14 : vector<128x1xf32>
    %17 = vector.extract_strided_slice %11 {offsets = [0, 0], sizes = [32, 256], strides = [1, 1]} : vector<128x256xf32> to vector<32x256xf32>
    %18 = vector.extract_strided_slice %6 {offsets = [0, 0], sizes = [32, 256], strides = [1, 1]} : vector<128x256xf32> to vector<32x256xf32>
    %cst_7 = arith.constant dense<0.000000e+00> : vector<32x32xf32>
    %19 = tpu.matmul %17, %18, %cst_7 {dimension_numbers = #tpu.dot_dimension_numbers<[1], [1], [0], [0], [0, 0, 1, 0], [], []>} : vector<32x256xf32>, vector<32x256xf32>, vector<32x32xf32> -> vector<32x32xf32>
    %20 = vector.extract_strided_slice %16 {offsets = [0, 0], sizes = [32, 1], strides = [1, 1]} : vector<128x1xf32> to vector<32x1xf32>
    %21 = vector.broadcast %20 : vector<32x1xf32> to vector<32x32xf32>
    %22 = arith.mulf %19, %21 : vector<32x32xf32>
    %23 = tpu.transpose %22, [1, 0] : vector<32x32xf32> -> vector<32x32xf32>
    %24 = vector.extract_strided_slice %4 {offsets = [0, 0], sizes = [32, 256], strides = [1, 1]} : vector<128x256xf32> to vector<32x256xf32>
    %cst_8 = arith.constant dense<0.000000e+00> : vector<32x256xf32>
    %25 = tpu.matmul %23, %24, %cst_8 {dimension_numbers = #tpu.dot_dimension_numbers<[1], [0], [0], [1], [0, 0, 1, 1], [], []>} : vector<32x32xf32>, vector<32x256xf32>, vector<32x256xf32> -> vector<32x256xf32>
    %26 = vector.extract_strided_slice %11 {offsets = [32, 0], sizes = [32, 256], strides = [1, 1]} : vector<128x256xf32> to vector<32x256xf32>
    %27 = vector.extract_strided_slice %6 {offsets = [32, 0], sizes = [32, 256], strides = [1, 1]} : vector<128x256xf32> to vector<32x256xf32>
    %cst_9 = arith.constant dense<0.000000e+00> : vector<32x32xf32>
    %28 = tpu.matmul %26, %27, %cst_9 {dimension_numbers = #tpu.dot_dimension_numbers<[1], [1], [0], [0], [0, 0, 1, 0], [], []>} : vector<32x256xf32>, vector<32x256xf32>, vector<32x32xf32> -> vector<32x32xf32>
    %29 = vector.extract_strided_slice %16 {offsets = [32, 0], sizes = [32, 1], strides = [1, 1]} : vector<128x1xf32> to vector<32x1xf32>
    %30 = vector.broadcast %29 : vector<32x1xf32> to vector<32x32xf32>
    %31 = arith.mulf %28, %30 : vector<32x32xf32>
    %32 = tpu.transpose %31, [1, 0] : vector<32x32xf32> -> vector<32x32xf32>
    %33 = vector.extract_strided_slice %4 {offsets = [32, 0], sizes = [32, 256], strides = [1, 1]} : vector<128x256xf32> to vector<32x256xf32>
    %cst_10 = arith.constant dense<0.000000e+00> : vector<32x256xf32>
    %34 = tpu.matmul %32, %33, %cst_10 {dimension_numbers = #tpu.dot_dimension_numbers<[1], [0], [0], [1], [0, 0, 1, 1], [], []>} : vector<32x32xf32>, vector<32x256xf32>, vector<32x256xf32> -> vector<32x256xf32>
    %35 = vector.extract_strided_slice %11 {offsets = [64, 0], sizes = [32, 256], strides = [1, 1]} : vector<128x256xf32> to vector<32x256xf32>
    %36 = vector.extract_strided_slice %6 {offsets = [64, 0], sizes = [32, 256], strides = [1, 1]} : vector<128x256xf32> to vector<32x256xf32>
    %cst_11 = arith.constant dense<0.000000e+00> : vector<32x32xf32>
    %37 = tpu.matmul %35, %36, %cst_11 {dimension_numbers = #tpu.dot_dimension_numbers<[1], [1], [0], [0], [0, 0, 1, 0], [], []>} : vector<32x256xf32>, vector<32x256xf32>, vector<32x32xf32> -> vector<32x32xf32>
    %38 = vector.extract_strided_slice %16 {offsets = [64, 0], sizes = [32, 1], strides = [1, 1]} : vector<128x1xf32> to vector<32x1xf32>
    %39 = vector.broadcast %38 : vector<32x1xf32> to vector<32x32xf32>
    %40 = arith.mulf %37, %39 : vector<32x32xf32>
    %41 = tpu.transpose %40, [1, 0] : vector<32x32xf32> -> vector<32x32xf32>
    %42 = vector.extract_strided_slice %4 {offsets = [64, 0], sizes = [32, 256], strides = [1, 1]} : vector<128x256xf32> to vector<32x256xf32>
    %cst_12 = arith.constant dense<0.000000e+00> : vector<32x256xf32>
    %43 = tpu.matmul %41, %42, %cst_12 {dimension_numbers = #tpu.dot_dimension_numbers<[1], [0], [0], [1], [0, 0, 1, 1], [], []>} : vector<32x32xf32>, vector<32x256xf32>, vector<32x256xf32> -> vector<32x256xf32>
    %44 = vector.extract_strided_slice %11 {offsets = [96, 0], sizes = [32, 256], strides = [1, 1]} : vector<128x256xf32> to vector<32x256xf32>
    %45 = vector.extract_strided_slice %6 {offsets = [96, 0], sizes = [32, 256], strides = [1, 1]} : vector<128x256xf32> to vector<32x256xf32>
    %cst_13 = arith.constant dense<0.000000e+00> : vector<32x32xf32>
    %46 = tpu.matmul %44, %45, %cst_13 {dimension_numbers = #tpu.dot_dimension_numbers<[1], [1], [0], [0], [0, 0, 1, 0], [], []>} : vector<32x256xf32>, vector<32x256xf32>, vector<32x32xf32> -> vector<32x32xf32>
    %47 = vector.extract_strided_slice %16 {offsets = [96, 0], sizes = [32, 1], strides = [1, 1]} : vector<128x1xf32> to vector<32x1xf32>
    %48 = vector.broadcast %47 : vector<32x1xf32> to vector<32x32xf32>
    %49 = arith.mulf %46, %48 : vector<32x32xf32>
    %50 = tpu.transpose %49, [1, 0] : vector<32x32xf32> -> vector<32x32xf32>
    %51 = vector.extract_strided_slice %4 {offsets = [96, 0], sizes = [32, 256], strides = [1, 1]} : vector<128x256xf32> to vector<32x256xf32>
    %cst_14 = arith.constant dense<0.000000e+00> : vector<32x256xf32>
    %52 = tpu.matmul %50, %51, %cst_14 {dimension_numbers = #tpu.dot_dimension_numbers<[1], [0], [0], [1], [0, 0, 1, 1], [], []>} : vector<32x32xf32>, vector<32x256xf32>, vector<32x256xf32> -> vector<32x256xf32>
    %53 = tpu.concatenate %25, %34, %43, %52 in 0 : vector<32x256xf32>, vector<32x256xf32>, vector<32x256xf32>, vector<32x256xf32> -> vector<128x256xf32>
    %c0_15 = arith.constant 0 : index
    %c0_16 = arith.constant 0 : index
    %54 = vector.load %arg3[%c0_15, %c0_16] : memref<4x128xf32, #tpu.memory_space<vmem>>, vector<4x128xf32>
    %cst_17 = arith.constant dense<0.000000e+00> : vector<4x256xf32>
    %55 = tpu.matmul %54, %53, %cst_17 {dimension_numbers = #tpu.dot_dimension_numbers<[1], [0], [0], [1], [0, 0, 1, 1], [], []>} : vector<4x128xf32>, vector<128x256xf32>, vector<4x256xf32> -> vector<4x256xf32>
    %c0_18 = arith.constant 0 : index
    %c0_19 = arith.constant 0 : index
    %56 = vector.load %arg4[%c0_18, %c0_19] : memref<4x1xf32, #tpu.memory_space<vmem>>, vector<4x1xf32>
    %57 = vector.broadcast %56 : vector<4x1xf32> to vector<4x256xf32>
    %58 = arith.addf %55, %57 : vector<4x256xf32>
    %c0_20 = arith.constant 0 : index
    %c0_21 = arith.constant 0 : index
    %c0_22 = arith.constant 0 : index
    %59 = vector.load %arg5[%c0_20, %c0_21, %c0_22] : memref<1x4x256xf32, #tpu.memory_space<vmem>>, vector<1x4x256xf32>
    %60 = vector.shape_cast %59 : vector<1x4x256xf32> to vector<4x256xf32>
    %61 = vector.shape_cast %58 : vector<4x256xf32> to vector<1x4x256xf32>
    tpu.vector_store %arg5[%c0_20, %c0_21, %c0_22], %61 {strides = array<i32>} : memref<1x4x256xf32, #tpu.memory_space<vmem>>, vector<1x4x256xf32>,
    return
  }
  func.func @transform_0(%arg0: i32) -> (i32, i32, i32) {
    %c0_i32 = arith.constant 0 : i32
    %c0_i32_0 = arith.constant 0 : i32
    %c0_i32_1 = arith.constant 0 : i32
    return %arg0, %c0_i32, %c0_i32_0 : i32, i32, i32
  }
  func.func @transform_1(%arg0: i32) -> (i32, i32) {
    %c0_i32 = arith.constant 0 : i32
    %c0_i32_0 = arith.constant 0 : i32
    %c0_i32_1 = arith.constant 0 : i32
    return %c0_i32, %c0_i32_0 : i32, i32
  }
  func.func @transform_2(%arg0: i32) -> (i32, i32) {
    %c0_i32 = arith.constant 0 : i32
    %c0_i32_0 = arith.constant 0 : i32
    %c0_i32_1 = arith.constant 0 : i32
    return %c0_i32, %c0_i32_0 : i32, i32
  }
  func.func @transform_3(%arg0: i32) -> (i32, i32) {
    %c0_i32 = arith.constant 0 : i32
    %c0_i32_0 = arith.constant 0 : i32
    %c0_i32_1 = arith.constant 0 : i32
    return %c0_i32, %c0_i32_0 : i32, i32
  }
  func.func @transform_4(%arg0: i32) -> (i32, i32, i32) {
    %c0_i32 = arith.constant 0 : i32
    %c0_i32_0 = arith.constant 0 : i32
    %c0_i32_1 = arith.constant 0 : i32
    return %arg0, %c0_i32, %c0_i32_0 : i32, i32, i32
  }
}

</mosaic_0001>

<bundles_post_ra>
// kernel: tpu_custom_call.1
= control target key start
LH: loop header
LB: loop body
LE: loop exit
PB: predicated region body
PF: predicated region fallthrough
CT: control target
= control target key end

     0   :  { %9 = vsyncpa [#allocation3], 0  ;;  %s2912_s0 = inlined_call_operand.vmem [shape: f32[2,4,256], index: 0, kind: input, shape index: {}]   ;;  %s2913_s1 = inlined_call_operand.vmem [shape: f32[384,4], index: 1, kind: input, shape index: {}]   ;;  %s2914_s2 = inlined_call_operand.vmem [shape: f32[4,128], index: 2, kind: input, shape index: {}]   ;;  %s2915_s3 = inlined_call_operand.vmem [shape: f32[4,1], index: 3, kind: input, shape index: {}]   ;;  %s2916_s4 = inlined_call_operand.hbm [shape: f32[2,4,256], index: 4, kind: output, shape index: {}]  }
   0x1   :  { %11 = vsyncpa [#allocation3 + $0x1], 0  ;;  %s2105_s15 = smov 0   ;;  %s2107_s16 = smov 0  }
   0x2   :  { %s2109_s17 = smov 0   ;;  %s2111_s18 = smov 0  }
   0x3 LB: > { %s2126_s19 = sadd.s32 4294967295, %s2077_s18   ;;  %s1731_s20 = sadd.s32 4294967294, %s2077_s18   ;;  %s2077_s18 = sphi %s2111_s18, %s2962_s18   ;;  %s2073_s17 = sphi %s2109_s17, %s2961_s17   ;;  %s2069_s16 = sphi %s2107_s16, %s2960_s16   ;;  %s2065_s15 = sphi %s2105_s15, %s2959_s15  }
   0x4   : > { %s2130_s21 = sadd.s32 1, %s2077_s18   ;;  %s113_s22 = sadd.s32 1, %s2073_s17 }
   0x5   : > { %s110_s23 = ssub.s32 %s2077_s18, %s2130_s21  ;;  %p123_p0 = scmp.ne.s32.totalorder %s2073_s17, %s2069_s16 }
   0x6   : > { %p111_p1 = scmp.eq.s32.totalorder %s110_s23, 0  ;;  %p124_p2 = scmp.eq.s32.totalorder %s2126_s19, 1 }
   0x7   : > { %p129_p3 = scmp.ne.s32.totalorder %s2069_s16, %s2065_s15  ;;  %p130_p4 = scmp.eq.s32.totalorder %s1731_s20, 1 }
   0x8   : > { %s2141_s24 = scalar_select %p111_p1, %s2073_s17, %s113_s22  }
   0x9   : > { %p2143_p5 = por %p124_p2, %p123_p0  ;;  %p2147_p6 = por %p130_p4, %p129_p3 }
   0xa   : > { %p1734_p7 = scmp.ge.s32.totalorder %s2077_s18, 1  ;;  %p165_p8 = scmp.lt.s32.totalorder %s2077_s18, 3 }
   0xc   : > { %p166_p9 = pnand %p1734_p7, %p165_p8 }
   0xe   : > { %169 = sbr.rel (%p166_p9) target bundleno = 2136 (0x858), region = 36 }
  0x13   : > { %p191_p10 = scmp.lt.s32.totalorder %s2126_s19, 1  ;;  %vm394_vm0 = vcmask 1043456   ;;  %v197_v1 = vld [vmem:[%s2913_s1] sm:$0xff]  ;;  %vm249_vm1 = vcmask 31744   ;;  %v198_v4 = vld [vmem:[%s2913_s1 + $0x8] sm:$0xff]  ;;  %v199_v5 = vld [vmem:[%s2913_s1 + $0x10] sm:$0xff] }
  0x14   : > { %v200_v6 = vld [vmem:[%s2913_s1 + $0x18] sm:$0xff]  ;;  %v201_v7 = vld [vmem:[%s2913_s1 + $0x20] sm:$0xff]  ;;  %v202_v8 = vld [vmem:[%s2913_s1 + $0x28] sm:$0xff]  ;;  %vm1039_vm2 = vcmask 261120   ;;  %s188_s30 = sand.u32 1, %s2069_s16   ;;  %s1874_s6 = sshll.u32 %s2126_s19, 3 }
  0x15   : > { %s192_s27 = scalar_select %p191_p10, %s2126_s19, 1  ;;  %v203_v9 = vld [vmem:[%s2913_s1 + $0x30] sm:$0xff]  ;;  %v204_v10 = vld [vmem:[%s2913_s1 + $0x38] sm:$0xff]  ;;  %v205_v11 = vld [vmem:[%s2913_s1 + $0x40] sm:$0xff] }
  0x16   : > { %v206_v12 = vld [vmem:[%s2913_s1 + $0x48] sm:$0xff]  ;;  %v207_v13 = vld [vmem:[%s2913_s1 + $0x50] sm:$0xff]  ;;  %v208_v14 = vld [vmem:[%s2913_s1 + $0x58] sm:$0xff]  ;;  %s1667_s9 = scalar_lea.hbm %s2916_s4, %s1874_s6  ;;  %s1656_s19 = scalar_lea.sflag [#allocation3], %s188_s30 }
  0x17   : > { %s1873_s28 = sshll.u32 %s192_s27, 3  ;;  %v209_v15 = vld [vmem:[%s2913_s1 + $0x60] sm:$0xff]  ;;  %v210_v16 = vld [vmem:[%s2913_s1 + $0x68] sm:$0xff]  ;;  %v211_v17 = vld [vmem:[%s2913_s1 + $0x70] sm:$0xff]  ;;  %s1671_s12 = sshll.u32 %s1667_s9, 4  ;;  %s1672_s12 = int_to_ptr.hbm [resolvable:$true] %s1671_s12 }
  0x18   : > { %s195_s5 = scalar_lea.vmem %s2912_s0, %s1873_s28  ;;  %v212_v18 = vld [vmem:[%s2913_s1 + $0x78] sm:$0xff]  ;;  %v213_v21 = vld [vmem:[%s2913_s1 + $0x80] sm:$0xff]  ;;  %v214_v24 = vld [vmem:[%s2913_s1 + $0x88] sm:$0xff]  ;;  %s2029_s13 = sshra.s32 %s1672_s12, 4  ;;  %s2030_s13 = int_to_ptr.hbm [resolvable:$true] %s2029_s13 }
  0x19   : > { %v196_v0 = vld [vmem:[%s195_s5] sm:$0xff]  ;;  %v215_v27 = vld [vmem:[%s2913_s1 + $0x90] sm:$0xff]  ;;  %v216_v30 = vld [vmem:[%s2913_s1 + $0x98] sm:$0xff]  ;;  %s1735_s5 = sshll.u32 %s188_s30, 3  ;;  %s2031_s14 = scalar_lea.hbm %s2030_s13, 8 }
  0x1a   : > { %246 = vst [vmem:[#allocation1] ss:$2 sm:$0xff] %v196_v0  ;;  %v217_v33 = vld [vmem:[%s2913_s1 + $0xa0] sm:$0xff]  ;;  %v218_v36 = vld [vmem:[%s2913_s1 + $0xa8] sm:$0xff]  ;;  %v219_v39 = vld [vmem:[%s2913_s1 + $0xb0] sm:$0xff]  ;;  %s190_s10 = scalar_lea.vmem [#allocation2], %s1735_s5  ;;  %p2032_p11 = scmp.ne.s32.totalorder %s2030_s13, %s2031_s14 }
  0x1b   : > { %v220_v42 = vld [vmem:[%s2913_s1 + $0xb8] sm:$0xff]  ;;  %v221_v45 = vld [vmem:[%s2913_s1 + $0xc0] sm:$0xff]  ;;  %v222_v48 = vld [vmem:[%s2913_s1 + $0xc8] sm:$0xff]  ;;  %s1669_s11 = sshll.u32 %s190_s10, 4  ;;  %s2035_s23 = scalar_lea.hbm %s2916_s4, 16  ;;  %s1670_s11 = int_to_ptr.vmem [resolvable:$true] %s1669_s11 }
  0x1c   : > { %v223_v51 = vld [vmem:[%s2913_s1 + $0xd0] sm:$0xff]  ;;  %v224_v54 = vld [vmem:[%s2913_s1 + $0xd8] sm:$0xff]  ;;  %v225_v57 = vld [vmem:[%s2913_s1 + $0xe0] sm:$0xff]  ;;  %p2033_p12 = pnand %p2032_p11, %p2143_p5  ;;  %p2036_p0 = scmp.lt.s32.totalorder %s2030_s13, %s2916_s4 }
  0x1d   : > { %v226_v60 = vld [vmem:[%s2913_s1 + $0xe8] sm:$0xff]  ;;  %v227_v63 = vld [vmem:[%s2913_s1 + $0xf0] sm:$0xff]  ;;  %p2037_p1 = scmp.lt.s32.totalorder %s2035_s23, %s2031_s14 }
  0x1e   : > { %p2034_p13 = pneg %p2033_p12 }
  0x1f   : > { %p2038_p2 = por %p2037_p1, %p2036_p0 }
  0x21   : > { %v247_v2 = vld.sshfl [vmem:[#allocation1] sm:$0xff pattern:$0x75316420]  ;;  %v248_v3 = vld.sshfl [vmem:[#allocation1 + $0x8] sm:$0xff pattern:$0x75316420]  ;;  %p2039_p3 = pnand %p2038_p2, %p2034_p13 }
  0x22   : > { %1738 = vmatpush.msk.msra.mxu0 %vm394_vm0, %v247_v2  ;;  %1787 = vmatpush.msk.msra.mxu1 %vm394_vm0, %v248_v3 }
  0x23   : > { %1739 = vmatmul.msk.f32.vlgmr.msra.gmra.mxu0 %vm249_vm1, %v197_v1  ;;  %1788 = vmatmul.msk.f32.vlgmr.msra.gmra.mxu1 %vm249_vm1, %v197_v1 }
  0x24   : > { %1875 = vmatpush.msk.msra.mxu2 %vm394_vm0, %v247_v2  ;;  %1876 = vmatpush.msk.msra.mxu3 %vm394_vm0, %v248_v3  ;;  %v228_v2 = vld [vmem:[%s2913_s1 + $0xf8] sm:$0xff] }
  0x2b   : > { %1740 = vmatmul.msk.f32.gmra.mxu0 %vm249_vm1, %v198_v4  ;;  %1789 = vmatmul.msk.f32.gmra.mxu1 %vm249_vm1, %v198_v4 }
  0x33   : > { %1741 = vmatmul.msk.f32.gmra.mxu0 %vm249_vm1, %v199_v5  ;;  %1790 = vmatmul.msk.f32.gmra.mxu1 %vm249_vm1, %v199_v5  ;;  %v229_v5 = vld [vmem:[%s2913_s1 + $0x100] sm:$0xff] }
  0x3b   : > { %1742 = vmatmul.msk.f32.gmra.mxu0 %vm249_vm1, %v200_v6  ;;  %1791 = vmatmul.msk.f32.gmra.mxu1 %vm249_vm1, %v200_v6 }
  0x43   : > { %1743 = vmatmul.msk.f32.gmra.mxu0 %vm249_vm1, %v201_v7  ;;  %1792 = vmatmul.msk.f32.gmra.mxu1 %vm249_vm1, %v201_v7 }
  0x4b   : > { %1744 = vmatmul.msk.f32.gmra.mxu0 %vm249_vm1, %v202_v8  ;;  %1793 = vmatmul.msk.f32.gmra.mxu1 %vm249_vm1, %v202_v8 }
  0x53   : > { %1745 = vmatmul.msk.f32.gmra.mxu0 %vm249_vm1, %v203_v9  ;;  %1794 = vmatmul.msk.f32.gmra.mxu1 %vm249_vm1, %v203_v9  ;;  %v230_v9 = vld [vmem:[%s2913_s1 + $0x108] sm:$0xff] }
  0x5b   : > { %1746 = vmatmul.msk.f32.gmra.mxu0 %vm249_vm1, %v204_v10  ;;  %1795 = vmatmul.msk.f32.gmra.mxu1 %vm249_vm1, %v204_v10 }
  0x63   : > { %1747 = vmatmul.msk.f32.gmra.mxu0 %vm249_vm1, %v205_v11  ;;  %1796 = vmatmul.msk.f32.gmra.mxu1 %vm249_vm1, %v205_v11 }
  0x6b   : > { %1748 = vmatmul.msk.f32.gmra.mxu0 %vm249_vm1, %v206_v12  ;;  %1797 = vmatmul.msk.f32.gmra.mxu1 %vm249_vm1, %v206_v12 }
  0x73   : > { %1749 = vmatmul.msk.f32.gmra.mxu0 %vm249_vm1, %v207_v13  ;;  %1798 = vmatmul.msk.f32.gmra.mxu1 %vm249_vm1, %v207_v13  ;;  %v231_v13 = vld [vmem:[%s2913_s1 + $0x110] sm:$0xff] }
  0x7b   : > { %1750 = vmatmul.msk.f32.gmra.mxu0 %vm249_vm1, %v208_v14  ;;  %1799 = vmatmul.msk.f32.gmra.mxu1 %vm249_vm1, %v208_v14 }
  0x83   : > { %1751 = vmatmul.msk.f32.gmra.mxu0 %vm249_vm1, %v209_v15  ;;  %1800 = vmatmul.msk.f32.gmra.mxu1 %vm249_vm1, %v209_v15 }
  0x8b   : > { %1752 = vmatmul.msk.f32.gmra.mxu0 %vm249_vm1, %v210_v16  ;;  %1801 = vmatmul.msk.f32.gmra.mxu1 %vm249_vm1, %v210_v16 }
  0x93   : > { %1753 = vmatmul.msk.f32.gmra.mxu0 %vm249_vm1, %v211_v17  ;;  %1802 = vmatmul.msk.f32.gmra.mxu1 %vm249_vm1, %v211_v17  ;;  %v232_v17 = vld [vmem:[%s2913_s1 + $0x118] sm:$0xff] }
  0x9b   : > { %1754 = vmatmul.msk.f32.gmra.mxu0 %vm249_vm1, %v212_v18  ;;  %1803 = vmatmul.msk.f32.gmra.mxu1 %vm249_vm1, %v212_v18 }
  0xa0   : > { %v2242_v19 = vpop.f32.mrf.mxu0  ;;  %v2244_v20 = vpop.f32.mrf.mxu1 }
  0xa3   : > { %1755 = vmatmul.msk.f32.gmra.mxu0 %vm249_vm1, %v213_v21  ;;  %1804 = vmatmul.msk.f32.gmra.mxu1 %vm249_vm1, %v213_v21 }
  0xa8   : > { %v2251_v22 = vpop.f32.mrf.mxu0  ;;  %v2253_v23 = vpop.f32.mrf.mxu1 }
  0xab   : > { %1756 = vmatmul.msk.f32.gmra.mxu0 %vm249_vm1, %v214_v24  ;;  %1805 = vmatmul.msk.f32.gmra.mxu1 %vm249_vm1, %v214_v24 }
  0xb0   : > { %v2260_v25 = vpop.f32.mrf.mxu0  ;;  %v2262_v26 = vpop.f32.mrf.mxu1 }
  0xb3   : > { %1757 = vmatmul.msk.f32.gmra.mxu0 %vm249_vm1, %v215_v27  ;;  %1806 = vmatmul.msk.f32.gmra.mxu1 %vm249_vm1, %v215_v27 }
  0xb8   : > { %v2269_v28 = vpop.f32.mrf.mxu0  ;;  %v2271_v29 = vpop.f32.mrf.mxu1 }
  0xbb   : > { %1758 = vmatmul.msk.f32.gmra.mxu0 %vm249_vm1, %v216_v30  ;;  %1807 = vmatmul.msk.f32.gmra.mxu1 %vm249_vm1, %v216_v30 }
  0xc0   : > { %v2278_v31 = vpop.f32.mrf.mxu0  ;;  %v2280_v32 = vpop.f32.mrf.mxu1 }
  0xc3   : > { %1759 = vmatmul.msk.f32.gmra.mxu0 %vm249_vm1, %v217_v33  ;;  %1808 = vmatmul.msk.f32.gmra.mxu1 %vm249_vm1, %v217_v33 }
  0xc8   : > { %v2287_v34 = vpop.f32.mrf.mxu0  ;;  %v2289_v35 = vpop.f32.mrf.mxu1 }
  0xcb   : > { %1760 = vmatmul.msk.f32.gmra.mxu0 %vm249_vm1, %v218_v36  ;;  %1809 = vmatmul.msk.f32.gmra.mxu1 %vm249_vm1, %v218_v36 }
  0xd0   : > { %v2296_v37 = vpop.f32.mrf.mxu0  ;;  %v2298_v38 = vpop.f32.mrf.mxu1 }
  0xd3   : > { %1761 = vmatmul.msk.f32.gmra.mxu0 %vm249_vm1, %v219_v39  ;;  %1810 = vmatmul.msk.f32.gmra.mxu1 %vm249_vm1, %v219_v39 }
  0xd8   : > { %v2305_v40 = vpop.f32.mrf.mxu0  ;;  %v2307_v41 = vpop.f32.mrf.mxu1 }
  0xdb   : > { %1762 = vmatmul.msk.f32.gmra.mxu0 %vm249_vm1, %v220_v42  ;;  %1811 = vmatmul.msk.f32.gmra.mxu1 %vm249_vm1, %v220_v42 }
  0xe0   : > { %v2314_v43 = vpop.f32.mrf.mxu0  ;;  %v2316_v44 = vpop.f32.mrf.mxu1 }
  0xe1   : > { %2921 = vst [vmem:[#allocation5_spill] sm:$0xff] %v2314_v43 }
  0xe2   : > { %2922 = vst [vmem:[#allocation6_spill] sm:$0xff] %v2316_v44 }
  0xe3   : > { %1763 = vmatmul.msk.f32.gmra.mxu0 %vm249_vm1, %v221_v45  ;;  %1812 = vmatmul.msk.f32.gmra.mxu1 %vm249_vm1, %v221_v45 }
  0xe8   : > { %v2323_v46 = vpop.f32.mrf.mxu0  ;;  %v2325_v47 = vpop.f32.mrf.mxu1 }
  0xe9   : > { %2923 = vst [vmem:[#allocation7_spill] sm:$0xff] %v2323_v46 }
  0xea   : > { %2924 = vst [vmem:[#allocation8_spill] sm:$0xff] %v2325_v47 }
  0xeb   : > { %1764 = vmatmul.msk.f32.gmra.mxu0 %vm249_vm1, %v222_v48  ;;  %1813 = vmatmul.msk.f32.gmra.mxu1 %vm249_vm1, %v222_v48 }
  0xf0   : > { %v2332_v49 = vpop.f32.mrf.mxu0  ;;  %v2334_v50 = vpop.f32.mrf.mxu1 }
  0xf1   : > { %2925 = vst [vmem:[#allocation9_spill] sm:$0xff] %v2332_v49 }
  0xf2   : > { %2926 = vst [vmem:[#allocation10_spill] sm:$0xff] %v2334_v50 }
  0xf3   : > { %1765 = vmatmul.msk.f32.gmra.mxu0 %vm249_vm1, %v223_v51  ;;  %1814 = vmatmul.msk.f32.gmra.mxu1 %vm249_vm1, %v223_v51 }
  0xf8   : > { %v2341_v52 = vpop.f32.mrf.mxu0  ;;  %v2343_v53 = vpop.f32.mrf.mxu1 }
  0xf9   : > { %2927 = vst [vmem:[#allocation11_spill] sm:$0xff] %v2343_v53 }
  0xfb   : > { %1766 = vmatmul.msk.f32.gmra.mxu0 %vm249_vm1, %v224_v54  ;;  %1815 = vmatmul.msk.f32.gmra.mxu1 %vm249_vm1, %v224_v54 }
 0x100   : > { %v2350_v55 = vpop.f32.mrf.mxu0  ;;  %v2352_v56 = vpop.f32.mrf.mxu1 }
 0x101   : > { %2928 = vst [vmem:[#allocation12_spill] sm:$0xff] %v2350_v55 }
 0x102   : > { %2929 = vst [vmem:[#allocation13_spill] sm:$0xff] %v2352_v56 }
 0x103   : > { %1767 = vmatmul.msk.f32.gmra.mxu0 %vm249_vm1, %v225_v57  ;;  %1816 = vmatmul.msk.f32.gmra.mxu1 %vm249_vm1, %v225_v57 }
 0x108   : > { %v2359_v58 = vpop.f32.mrf.mxu0  ;;  %v2361_v59 = vpop.f32.mrf.mxu1 }
 0x109   : > { %2930 = vst [vmem:[#allocation14_spill] sm:$0xff] %v2359_v58 }
 0x10a   : > { %2931 = vst [vmem:[#allocation15_spill] sm:$0xff] %v2361_v59 }
 0x10b   : > { %1768 = vmatmul.msk.f32.gmra.mxu0 %vm249_vm1, %v226_v60  ;;  %1817 = vmatmul.msk.f32.gmra.mxu1 %vm249_vm1, %v226_v60 }
 0x110   : > { %v2368_v61 = vpop.f32.mrf.mxu0  ;;  %v2370_v62 = vpop.f32.mrf.mxu1 }
 0x111   : > { %2932 = vst [vmem:[#allocation16_spill] sm:$0xff] %v2368_v61 }
 0x112   : > { %2933 = vst [vmem:[#allocation17_spill] sm:$0xff] %v2370_v62  ;;  %v243_v62 = vld [vmem:[%s2913_s1 + $0x170] sm:$0xff] }
 0x113   : > { %1769 = vmatmul.msk.f32.gmra.mxu0 %vm249_vm1, %v227_v63  ;;  %1818 = vmatmul.msk.f32.gmra.mxu1 %vm249_vm1, %v227_v63  ;;  %v238_v63 = vld [vmem:[%s2913_s1 + $0x148] sm:$0xff] }
 0x114   : > { %1780 = vmatmul.msk.f32.vlgmr.msra.gmra.mxu2 %vm249_vm1, %v238_v63  ;;  %1829 = vmatmul.msk.f32.vlgmr.msra.gmra.mxu3 %vm249_vm1, %v238_v63 }
 0x118   : > { %v2377_v0 = vpop.f32.mrf.mxu0  ;;  %v2379_v1 = vpop.f32.mrf.mxu1 }
 0x119   : > { %2934 = vst [vmem:[#allocation18_spill] sm:$0xff] %v2377_v0 }
 0x11a   : > { %2935 = vst [vmem:[#allocation19_spill] sm:$0xff] %v2379_v1 }
 0x11b   : > { %1770 = vmatmul.msk.f32.gmra.mxu0 %vm249_vm1, %v228_v2  ;;  %1819 = vmatmul.msk.f32.gmra.mxu1 %vm249_vm1, %v228_v2 }
 0x120   : > { %v2386_v3 = vpop.f32.mrf.mxu0  ;;  %v2388_v4 = vpop.f32.mrf.mxu1 }
 0x121   : > { %v721_v6 = vmax.f32 %v2386_v3, %v2388_v4 }
 0x123   : > { %1771 = vmatmul.msk.f32.gmra.mxu0 %vm249_vm1, %v229_v5  ;;  %1820 = vmatmul.msk.f32.gmra.mxu1 %vm249_vm1, %v229_v5 }
 0x124   : > { %722 = vmax.xlane.f32.xlu0 %v721_v6  ;;  %v239_v6 = vld [vmem:[%s2913_s1 + $0x150] sm:$0xff] }
 0x125   : > { %1781 = vmatmul.msk.f32.gmra.mxu2 %vm249_vm1, %v239_v6  ;;  %1830 = vmatmul.msk.f32.gmra.mxu3 %vm249_vm1, %v239_v6 }
 0x128   : > { %v2397_v7 = vpop.f32.mrf.mxu0  ;;  %v2399_v8 = vpop.f32.mrf.mxu1 }
 0x129   : > { %v724_v10 = vmax.f32 %v2397_v7, %v2399_v8 }
 0x12b   : > { %1772 = vmatmul.msk.f32.gmra.mxu0 %vm249_vm1, %v230_v9  ;;  %1821 = vmatmul.msk.f32.gmra.mxu1 %vm249_vm1, %v230_v9 }
 0x12c   : > { %725 = vmax.xlane.f32.xlu0 %v724_v10 }
 0x130   : > { %v2408_v11 = vpop.f32.mrf.mxu0  ;;  %v2410_v12 = vpop.f32.mrf.mxu1 }
 0x131   : > { %v727_v14 = vmax.f32 %v2408_v11, %v2410_v12 }
 0x133   : > { %1773 = vmatmul.msk.f32.gmra.mxu0 %vm249_vm1, %v231_v13  ;;  %1822 = vmatmul.msk.f32.gmra.mxu1 %vm249_vm1, %v231_v13  ;;  %v240_v13 = vld [vmem:[%s2913_s1 + $0x158] sm:$0xff] }
 0x134   : > { %728 = vmax.xlane.f32.xlu1 %v727_v14  ;;  %1782 = vmatmul.msk.f32.gmra.mxu2 %vm249_vm1, %v240_v13 }
 0x135   : > { %1831 = vmatmul.msk.f32.gmra.mxu3 %vm249_vm1, %v240_v13  ;;  %v242_v13 = vld [vmem:[%s2913_s1 + $0x168] sm:$0xff] }
 0x138   : > { %v2419_v15 = vpop.f32.mrf.mxu0  ;;  %v2421_v16 = vpop.f32.mrf.mxu1 }
 0x139   : > { %v730_v18 = vmax.f32 %v2419_v15, %v2421_v16 }
 0x13b   : > { %1774 = vmatmul.msk.f32.gmra.mxu0 %vm249_vm1, %v232_v17  ;;  %1823 = vmatmul.msk.f32.gmra.mxu1 %vm249_vm1, %v232_v17 }
 0x13c   : > { %731 = vmax.xlane.f32.xlu1 %v730_v18  ;;  %v241_v18 = vld [vmem:[%s2913_s1 + $0x160] sm:$0xff] }
 0x13d   : > { %1783 = vmatmul.msk.f32.gmra.mxu2 %vm249_vm1, %v241_v18  ;;  %1832 = vmatmul.msk.f32.gmra.mxu3 %vm249_vm1, %v241_v18 }
 0x140   : > { %v2430_v21 = vpop.f32.mrf.mxu0  ;;  %v2432_v24 = vpop.f32.mrf.mxu1 }
 0x145   : > { %1784 = vmatmul.msk.f32.gmra.mxu2 %vm249_vm1, %v242_v13  ;;  %1833 = vmatmul.msk.f32.gmra.mxu3 %vm249_vm1, %v242_v13 }
 0x148   : > { %v2434_v27 = vpop.f32.mrf.mxu0  ;;  %v2436_v30 = vpop.f32.mrf.mxu1 }
 0x14d   : > { %1785 = vmatmul.msk.f32.gmra.mxu2 %vm249_vm1, %v243_v62  ;;  %1834 = vmatmul.msk.f32.gmra.mxu3 %vm249_vm1, %v243_v62 }
 0x150   : > { %v2438_v33 = vpop.f32.mrf.mxu0  ;;  %v2440_v36 = vpop.f32.mrf.mxu1 }
 0x158   : > { %v2442_v39 = vpop.f32.mrf.mxu0  ;;  %v2444_v42 = vpop.f32.mrf.mxu1 }
 0x160   : > { %v2446_v45 = vpop.f32.mrf.mxu0  ;;  %v2448_v48 = vpop.f32.mrf.mxu1 }
 0x168   : > { %v2450_v51 = vpop.f32.mrf.mxu0  ;;  %v2452_v54 = vpop.f32.mrf.mxu1 }
 0x170   : > { %v2454_v57 = vpop.f32.mrf.mxu0  ;;  %v2456_v60 = vpop.f32.mrf.mxu1 }
 0x178   : > { %v2463_v2 = vpop.f32.mrf.mxu0  ;;  %v2465_v5 = vpop.f32.mrf.mxu1 }
 0x180   : > { %v2472_v9 = vpop.f32.mrf.mxu0  ;;  %v2474_v10 = vpop.f32.mrf.mxu1 }
 0x188   : > { %v2481_v14 = vpop.f32.mrf.mxu0  ;;  %v2483_v17 = vpop.f32.mrf.mxu1 }
 0x190   : > { %v2490_v63 = vpop.f32.mrf.mxu0  ;;  %v2492_v6 = vpop.f32.mrf.mxu1 }
 0x191   : > { %2936 = vst [vmem:[#allocation20_spill] sm:$0xff] %v2490_v63 }
 0x192   : > { %2937 = vst [vmem:[#allocation21_spill] sm:$0xff] %v2492_v6 }
 0x197   : > { %v723_v56 = vpop.xlane.xlu0 %722 }
 0x198   : > { %v769_v55 = vsub.f32 %v2386_v3, %v723_v56  ;;  %v770_v59 = vsub.f32 %v2388_v4, %v723_v56  ;;  %v2501_v58 = vpop.f32.mrf.mxu0  ;;  %v2503_v18 = vpop.f32.mrf.mxu1  ;;  %v244_v56 = vld [vmem:[%s2913_s1 + $0x178] sm:$0xff] }
 0x199   : > { %1786 = vmatmul.msk.f32.gmra.mxu2 %vm249_vm1, %v244_v56  ;;  %1835 = vmatmul.msk.f32.gmra.mxu3 %vm249_vm1, %v244_v56 }
 0x19a   : > { %v801_v61 = vmul.f32 1.442695, %v769_v55  ;;  %v803_v1 = vmul.f32 1.442695, %v770_v59 }
 0x19c   : > { %1919 = vpow2.f32 %v801_v61 }
 0x19d   : > { %1921 = vpow2.f32 %v803_v1 }
 0x19f   : > { %v726_v13 = vpop.xlane.xlu0 %725 }
 0x1a0   : > { %v771_v3 = vsub.f32 %v2397_v7, %v726_v13  ;;  %v772_v4 = vsub.f32 %v2399_v8, %v726_v13  ;;  %v512_v0 = vpop.f32.mrf.mxu0  ;;  %v673_v63 = vpop.f32.mrf.mxu1 }
 0x1a2   : > { %v1920_v6 = vpop.eup %1919  ;;  %v805_v55 = vmul.f32 1.442695, %v771_v3  ;;  %v807_v59 = vmul.f32 1.442695, %v772_v4 }
 0x1a3   : > { %v1922_v61 = vpop.eup %1921 }
 0x1a4   : > { %1923 = vpow2.f32 %v805_v55  ;;  %v865_v62 = vadd.f32 %v1922_v61, %v1920_v6 }
 0x1a5   : > { %1925 = vpow2.f32 %v807_v59 }
 0x1a6   : > { %866 = vadd.xlane.f32.xlu2 %v865_v62 }
 0x1a7   : > { %v729_v1 = vpop.xlane.xlu1 %728 }
 0x1a8   : > { %v773_v44 = vsub.f32 %v2408_v11, %v729_v1  ;;  %v774_v7 = vsub.f32 %v2410_v12, %v729_v1  ;;  %v515_v8 = vpop.f32.mrf.mxu0  ;;  %v676_v13 = vpop.f32.mrf.mxu1 }
 0x1aa   : > { %v1924_v43 = vpop.eup %1923  ;;  %v809_v47 = vmul.f32 1.442695, %v773_v44  ;;  %v811_v3 = vmul.f32 1.442695, %v774_v7  ;;  %v733_v44 = vmax.f32 %v2430_v21, %v2432_v24 }
 0x1ab   : > { %v1926_v4 = vpop.eup %1925 }
 0x1ac   : > { %1927 = vpow2.f32 %v809_v47  ;;  %v868_v46 = vadd.f32 %v1926_v4, %v1924_v43 }
 0x1ad   : > { %1929 = vpow2.f32 %v811_v3  ;;  %v739_v3 = vmax.f32 %v2438_v33, %v2440_v36 }
 0x1ae   : > { %869 = vadd.xlane.f32.xlu2 %v868_v46 }
 0x1af   : > { %v732_v56 = vpop.xlane.xlu1 %731 }
 0x1b0   : > { %v775_v55 = vsub.f32 %v2419_v15, %v732_v56  ;;  %v776_v59 = vsub.f32 %v2421_v16, %v732_v56  ;;  %v518_v62 = vpop.f32.mrf.mxu0  ;;  %v679_v50 = vpop.f32.mrf.mxu1  ;;  %v233_v56 = vld [vmem:[%s2913_s1 + $0x120] sm:$0xff] }
 0x1b1   : > { %1775 = vmatmul.msk.f32.gmra.mxu0 %vm249_vm1, %v233_v56  ;;  %1824 = vmatmul.msk.f32.gmra.mxu1 %vm249_vm1, %v233_v56 }
 0x1b2   : > { %v1928_v11 = vpop.eup %1927  ;;  %v813_v49 = vmul.f32 1.442695, %v775_v55  ;;  %v815_v12 = vmul.f32 1.442695, %v776_v59 }
 0x1b3   : > { %v1930_v1 = vpop.eup %1929 }
 0x1b4   : > { %1931 = vpow2.f32 %v813_v49  ;;  %v871_v53 = vadd.f32 %v1930_v1, %v1928_v11  ;;  %v736_v49 = vmax.f32 %v2434_v27, %v2436_v30 }
 0x1b5   : > { %1933 = vpow2.f32 %v815_v12 }
 0x1b6   : > { %872 = vadd.xlane.f32.xlu0 %v871_v53  ;;  %734 = vmax.xlane.f32.xlu2 %v733_v44 }
 0x1b8   : > { %v521_v46 = vpop.f32.mrf.mxu0  ;;  %v682_v47 = vpop.f32.mrf.mxu1 }
 0x1b9   : > { %957 = vmatpush.xpose.msrb.mxu2 %v521_v46  ;;  %986 = vmatpush.xpose.msrb.mxu3 %v682_v47  ;;  %v234_v47 = vld [vmem:[%s2913_s1 + $0x128] sm:$0xff] }
 0x1ba   : > { %v1932_v15 = vpop.eup %1931  ;;  %1776 = vmatmul.msk.f32.gmra.mxu0 %vm249_vm1, %v234_v47  ;;  %1825 = vmatmul.msk.f32.gmra.mxu1 %vm249_vm1, %v234_v47 }
 0x1bb   : > { %v1934_v16 = vpop.eup %1933 }
 0x1bc   : > { %v874_v7 = vadd.f32 %v1934_v16, %v1932_v15 }
 0x1bd   : > { %958 = vmatpush.xpose.msrb.mxu2 %v518_v62  ;;  %987 = vmatpush.xpose.msrb.mxu3 %v679_v50  ;;  %v742_v50 = vmax.f32 %v2442_v39, %v2444_v42 }
 0x1be   : > { %875 = vadd.xlane.f32.xlu1 %v874_v7  ;;  %740 = vmax.xlane.f32.xlu2 %v739_v3 }
 0x1c1   : > { %959 = vmatpush.xpose.msrb.mxu2 %v515_v8  ;;  %988 = vmatpush.xpose.msrb.mxu3 %v676_v13 }
 0x1c5   : > { %960 = vmatpush.xpose.msrb.mxu2 %v512_v0  ;;  %989 = vmatpush.xpose.msrb.mxu3 %v673_v63 }
 0x1c6   : > { %737 = vmax.xlane.f32.xlu1 %v736_v49 }
 0x1c8   : > { %961 = vmatmul.f32.vlgmr.msrb.gmra.mxu2 %v1920_v6  ;;  %990 = vmatmul.f32.vlgmr.msrb.gmra.mxu3 %v1922_v61 }
 0x1c9   : > { %1064 = vmatpush.msra.mxu2 %v2269_v28  ;;  %1093 = vmatpush.msra.mxu3 %v2271_v29 }
 0x1cb   : > { %1065 = vmatpush.msra.mxu2 %v2260_v25  ;;  %1094 = vmatpush.msra.mxu3 %v2262_v26  ;;  %v2537_v25 = vpop.f32.mrf.mxu2  ;;  %v2539_v26 = vpop.f32.mrf.mxu3 }
 0x1cd   : > { %1066 = vmatpush.msra.mxu2 %v2251_v22  ;;  %1095 = vmatpush.msra.mxu3 %v2253_v23 }
 0x1ce   : > { %743 = vmax.xlane.f32.xlu1 %v742_v50 }
 0x1cf   : > { %1096 = vmatpush.msra.mxu3 %v2244_v20  ;;  %1067 = vmatpush.msra.mxu2 %v2242_v19 }
 0x1d0   : > { %964 = vmatmul.f32.gmra.mxu2 %v1924_v43  ;;  %993 = vmatmul.f32.gmra.mxu3 %v1926_v4 }
 0x1d3   : > { %v2541_v22 = vpop.f32.mrf.mxu2  ;;  %v2543_v23 = vpop.f32.mrf.mxu3 }
 0x1d8   : > { %967 = vmatmul.f32.gmra.mxu2 %v1928_v11  ;;  %996 = vmatmul.f32.gmra.mxu3 %v1930_v1 }
 0x1db   : > { %v2545_v28 = vpop.f32.mrf.mxu2  ;;  %v2547_v29 = vpop.f32.mrf.mxu3 }
 0x1e0   : > { %970 = vmatmul.f32.gmra.mxu2 %v1932_v15  ;;  %999 = vmatmul.f32.gmra.mxu3 %v1934_v16 }
 0x1e3   : > { %v2551_v43 = vpop.f32.mrf.mxu2  ;;  %v2553_v53 = vpop.f32.mrf.mxu3 }
 0x1e4   : > { %2938 = vst [vmem:[#allocation22_spill] sm:$0xff] %v2551_v43 }
 0x1e5   : > { %2939 = vst [vmem:[#allocation23_spill] sm:$0xff] %v2553_v53 }
 0x1eb   : > { %v2557_v13 = vpop.f32.mrf.mxu2  ;;  %v2559_v4 = vpop.f32.mrf.mxu3 }
 0x1f3   : > { %v2576_v46 = vpop.f32.mrf.mxu2 }
 0x219   : > { %v867_v20 = vpop.xlane.xlu2 %866 }
 0x221   : > { %v2549_v19 = vpop.xlane.xlu2 %869 }
 0x229   : > { %v735_v0 = vpop.xlane.xlu2 %734 }
 0x22a   : > { %v777_v63 = vsub.f32 %v2430_v21, %v735_v0  ;;  %v778_v6 = vsub.f32 %v2432_v24, %v735_v0 }
 0x22c   : > { %v817_v61 = vmul.f32 1.442695, %v777_v63  ;;  %v819_v8 = vmul.f32 1.442695, %v778_v6  ;;  %v235_v63 = vld [vmem:[%s2913_s1 + $0x130] sm:$0xff] }
 0x22d   : > { %1777 = vmatmul.msk.f32.gmra.mxu0 %vm249_vm1, %v235_v63  ;;  %1826 = vmatmul.msk.f32.gmra.mxu1 %vm249_vm1, %v235_v63  ;;  %v873_v63 = vpop.xlane.xlu0 %872 }
 0x22e   : > { %1935 = vpow2.f32 %v817_v61 }
 0x22f   : > { %1937 = vpow2.f32 %v819_v8 }
 0x231   : > { %v2566_v55 = vpop.xlane.xlu1 %875  ;;  %v741_v21 = vpop.xlane.xlu2 %740 }
 0x232   : > { %v781_v24 = vsub.f32 %v2438_v33, %v741_v21  ;;  %v782_v59 = vsub.f32 %v2440_v36, %v741_v21  ;;  %v2581_v33 = vpop.f32.mrf.mxu3 }
 0x234   : > { %v2570_v62 = vpop.eup %1935  ;;  %v825_v11 = vmul.f32 1.442695, %v781_v24  ;;  %v827_v12 = vmul.f32 1.442695, %v782_v59 }
 0x235   : > { %v2572_v1 = vpop.eup %1937 }
 0x236   : > { %1939 = vpow2.f32 %v825_v11  ;;  %v877_v44 = vadd.f32 %v2572_v1, %v2570_v62 }
 0x237   : > { %1941 = vpow2.f32 %v827_v12  ;;  %v745_v12 = vmax.f32 %v2446_v45, %v2448_v48 }
 0x238   : > { %878 = vadd.xlane.f32.xlu2 %v877_v44 }
 0x239   : > { %v738_v36 = vpop.xlane.xlu1 %737 }
 0x23a   : > { %v779_v15 = vsub.f32 %v2434_v27, %v738_v36  ;;  %v780_v16 = vsub.f32 %v2436_v30, %v738_v36  ;;  %v2598_v27 = vpop.f32.mrf.mxu2  ;;  %v2600_v6 = vpop.f32.mrf.mxu3 }
 0x23c   : > { %v2587_v7 = vpop.eup %1939  ;;  %v821_v3 = vmul.f32 1.442695, %v779_v15  ;;  %v823_v49 = vmul.f32 1.442695, %v780_v16 }
 0x23d   : > { %v2589_v50 = vpop.eup %1941 }
 0x23e   : > { %1943 = vpow2.f32 %v821_v3  ;;  %v883_v0 = vadd.f32 %v2589_v50, %v2587_v7 }
 0x23f   : > { %1945 = vpow2.f32 %v823_v49  ;;  %v748_v49 = vmax.f32 %v2450_v51, %v2452_v54 }
 0x240   : > { %884 = vadd.xlane.f32.xlu2 %v883_v0  ;;  %1947 = vrcp.f32 %v867_v20 }
 0x241   : > { %v744_v30 = vpop.xlane.xlu1 %743 }
 0x242   : > { %v783_v61 = vsub.f32 %v2442_v39, %v744_v30  ;;  %v784_v8 = vsub.f32 %v2444_v42, %v744_v30  ;;  %v236_v39 = vld [vmem:[%s2913_s1 + $0x138] sm:$0xff] }
 0x243   : > { %1778 = vmatmul.msk.f32.gmra.mxu0 %vm249_vm1, %v236_v39  ;;  %1827 = vmatmul.msk.f32.gmra.mxu1 %vm249_vm1, %v236_v39 }
 0x244   : > { %v2604_v56 = vpop.eup %1943  ;;  %v829_v21 = vmul.f32 1.442695, %v783_v61  ;;  %v831_v24 = vmul.f32 1.442695, %v784_v8 }
 0x245   : > { %v2606_v59 = vpop.eup %1945 }
 0x246   : > { %1949 = vpow2.f32 %v829_v21  ;;  %v880_v11 = vadd.f32 %v2606_v59, %v2604_v56  ;;  %v1948_v42 = vpop.eup %1947 }
 0x247   : > { %1951 = vpow2.f32 %v831_v24  ;;  %v929_v36 = vmul.f32 0.17677669, %v1948_v42 }
 0x248   : > { %881 = vadd.xlane.f32.xlu1 %v880_v11  ;;  %746 = vmax.xlane.f32.xlu2 %v745_v12  ;;  %1953 = vrcp.f32 %v2549_v19  ;;  %v751_v11 = vmax.f32 %v2454_v57, %v2456_v60 }
 0x249   : > { %1955 = vrcp.f32 %v873_v63 }
 0x24a   : > { %1957 = vrcp.f32 %v2566_v55  ;;  %v524_v55 = vpop.f32.mrf.mxu0 }
 0x24b   : > { %v962_v20 = vpop.f32.mrf.mxu2  ;;  %v991_v44 = vpop.f32.mrf.mxu3 }
 0x24c   : > { %v2618_v47 = vpop.eup %1949  ;;  %v992_v15 = vadd.f32 %v991_v44, %v962_v20 }
 0x24d   : > { %v2620_v16 = vpop.eup %1951 }
 0x24e   : > { %v886_v3 = vadd.f32 %v2620_v16, %v2618_v47  ;;  %v1003_v0 = vmul.f32 %v992_v15, %v929_v36  ;;  %v1954_v30 = vpop.eup %1953  ;;  %v754_v15 = vmax.f32 %v2463_v2, %v2465_v5 }
 0x24f   : > { %v930_v8 = vmul.f32 0.17677669, %v1954_v30  ;;  %v1956_v12 = vpop.eup %1955 }
 0x250   : > { %887 = vadd.xlane.f32.xlu1 %v886_v3  ;;  %749 = vmax.xlane.f32.xlu2 %v748_v49  ;;  %v931_v20 = vmul.f32 0.17677669, %v1956_v12  ;;  %v1958_v3 = vpop.eup %1957 }
 0x251   : > { %1007 = vxpose.xlu0.b32.start [1/4] (short) (narrow) %v1003_v0, 32  ;;  %v932_v63 = vmul.f32 0.17677669, %v1958_v3 }
 0x253   : > { %v965_v19 = vpop.f32.mrf.mxu2  ;;  %v994_v61 = vpop.f32.mrf.mxu3 }
 0x254   : > { %v995_v21 = vadd.f32 %v994_v61, %v965_v19 }
 0x256   : > { %v1004_v24 = vmul.f32 %v995_v21, %v930_v8  ;;  %v685_v8 = vpop.f32.mrf.mxu1 }
 0x258   : > { %752 = vmax.xlane.f32.xlu2 %v751_v11 }
 0x259   : > { %1008 = vxpose.xlu0.b32.cont [2/4] (short) (narrow) %v1004_v24, 32  ;;  %v527_v24 = vpop.f32.mrf.mxu0 }
 0x25b   : > { %v968_v39 = vpop.f32.mrf.mxu2  ;;  %v997_v42 = vpop.f32.mrf.mxu3 }
 0x25c   : > { %v998_v44 = vadd.f32 %v997_v42, %v968_v39 }
 0x25e   : > { %v1005_v36 = vmul.f32 %v998_v44, %v931_v20  ;;  %v688_v11 = vpop.f32.mrf.mxu1 }
 0x260   : > { %755 = vmax.xlane.f32.xlu2 %v754_v15 }
 0x261   : > { %1009 = vxpose.xlu0.b32.cont [3/4] (short) (narrow) %v1005_v36, 32 }
 0x263   : > { %v971_v49 = vpop.f32.mrf.mxu2  ;;  %v1000_v0 = vpop.f32.mrf.mxu3 }
 0x264   : > { %v1001_v30 = vadd.f32 %v1000_v0, %v971_v49 }
 0x266   : > { %v1006_v19 = vmul.f32 %v1001_v30, %v932_v63 }
 0x269   : > { %1010 = vxpose.xlu0.b32.end [4/4] (short) (narrow) %v1006_v19, 32 }
 0x2aa   : > { %v530_v20 = vpop.f32.mrf.mxu0  ;;  %v691_v44 = vpop.f32.mrf.mxu1 }
 0x2ab   : > { %v2631_v61 = vpop.xlane.xlu2 %878 }
 0x2b3   : > { %v2633_v21 = vpop.xlane.xlu2 %884 }
 0x2bb   : > { %v747_v12 = vpop.xlane.xlu2 %746 }
 0x2bc   : > { %v785_v39 = vsub.f32 %v2446_v45, %v747_v12  ;;  %v786_v42 = vsub.f32 %v2448_v48, %v747_v12 }
 0x2be   : > { %v833_v36 = vmul.f32 1.442695, %v785_v39  ;;  %v835_v15 = vmul.f32 1.442695, %v786_v42 }
 0x2c0   : > { %1959 = vpow2.f32 %v833_v36  ;;  %v533_v63 = vpop.f32.mrf.mxu0  ;;  %v694_v30 = vpop.f32.mrf.mxu1 }
 0x2c1   : > { %1961 = vpow2.f32 %v835_v15  ;;  %1122 = vmatpush.xpose.msrb.mxu2 %v533_v63  ;;  %1151 = vmatpush.xpose.msrb.mxu3 %v694_v30 }
 0x2c3   : > { %v750_v3 = vpop.xlane.xlu2 %749 }
 0x2c4   : > { %v787_v49 = vsub.f32 %v2450_v51, %v750_v3  ;;  %v788_v0 = vsub.f32 %v2452_v54, %v750_v3 }
 0x2c5   : > { %1123 = vmatpush.xpose.msrb.mxu2 %v530_v20  ;;  %1152 = vmatpush.xpose.msrb.mxu3 %v691_v44 }
 0x2c6   : > { %v2639_v19 = vpop.eup %1959  ;;  %v837_v53 = vmul.f32 1.442695, %v787_v49  ;;  %v839_v43 = vmul.f32 1.442695, %v788_v0 }
 0x2c7   : > { %v2641_v45 = vpop.eup %1961 }
 0x2c8   : > { %1963 = vpow2.f32 %v837_v53  ;;  %v889_v48 = vadd.f32 %v2641_v45, %v2639_v19 }
 0x2c9   : > { %1965 = vpow2.f32 %v839_v43  ;;  %1124 = vmatpush.xpose.msrb.mxu2 %v527_v24  ;;  %1153 = vmatpush.xpose.msrb.mxu3 %v688_v11 }
 0x2ca   : > { %890 = vadd.xlane.f32.xlu2 %v889_v48 }
 0x2cb   : > { %v753_v51 = vpop.xlane.xlu2 %752 }
 0x2cc   : > { %v789_v54 = vsub.f32 %v2454_v57, %v753_v51  ;;  %v790_v12 = vsub.f32 %v2456_v60, %v753_v51 }
 0x2cd   : > { %1125 = vmatpush.xpose.msrb.mxu2 %v524_v55  ;;  %1154 = vmatpush.xpose.msrb.mxu3 %v685_v8  ;;  %v757_v8 = vmax.f32 %v2472_v9, %v2474_v10 }
 0x2ce   : > { %v2647_v39 = vpop.eup %1963  ;;  %v841_v42 = vmul.f32 1.442695, %v789_v54  ;;  %v843_v36 = vmul.f32 1.442695, %v790_v12 }
 0x2cf   : > { %v2649_v15 = vpop.eup %1965 }
 0x2d0   : > { %1967 = vpow2.f32 %v841_v42  ;;  %v892_v43 = vadd.f32 %v2649_v15, %v2647_v39 }
 0x2d1   : > { %1969 = vpow2.f32 %v843_v36 }
 0x2d2   : > { %893 = vadd.xlane.f32.xlu2 %v892_v43 }
 0x2d3   : > { %v756_v53 = vpop.xlane.xlu2 %755 }
 0x2d4   : > { %v791_v57 = vsub.f32 %v2463_v2, %v756_v53  ;;  %v792_v60 = vsub.f32 %v2465_v5, %v756_v53  ;;  %v766_v5 = vmax.f32 %v2501_v58, %v2503_v18 }
 0x2d6   : > { %v2655_v20 = vpop.eup %1967  ;;  %v845_v44 = vmul.f32 1.442695, %v791_v57  ;;  %v847_v24 = vmul.f32 1.442695, %v792_v60 }
 0x2d7   : > { %v2657_v3 = vpop.eup %1969 }
 0x2d8   : > { %1971 = vpow2.f32 %v845_v44  ;;  %v895_v11 = vadd.f32 %v2657_v3, %v2655_v20 }
 0x2d9   : > { %1973 = vpow2.f32 %v847_v24 }
 0x2da   : > { %896 = vadd.xlane.f32.xlu0 %v895_v11 }
 0x2de   : > { %v2661_v49 = vpop.eup %1971 }
 0x2df   : > { %v2663_v55 = vpop.eup %1973 }
 0x2e0   : > { %v898_v2 = vadd.f32 %v2663_v55, %v2661_v49 }
 0x2e2   : > { %899 = vadd.xlane.f32.xlu2 %v898_v2  ;;  %767 = vmax.xlane.f32.xlu0 %v766_v5 }
 0x2ea   : > { %758 = vmax.xlane.f32.xlu2 %v757_v8 }
 0x2f5   : > { %v1023_v0 = vpop.trf.xlu0 }
 0x2f6   : > { %1836 = vmatmul.msk.f32.vlgmr.msra.gmra.mxu2 %vm1039_vm2, %v1023_v0  ;;  %1840 = vmatmul.msk.f32.vlgmr.msra.gmra.mxu3 %vm1039_vm2, %v1023_v0 }
 0x2f7   : > { %1228 = vmatpush.msra.mxu2 %v2305_v40  ;;  %1257 = vmatpush.msra.mxu3 %v2307_v41 }
 0x2f9   : > { %1229 = vmatpush.msra.mxu2 %v2296_v37  ;;  %1258 = vmatpush.msra.mxu3 %v2298_v38 }
 0x2fb   : > { %1230 = vmatpush.msra.mxu2 %v2287_v34  ;;  %1259 = vmatpush.msra.mxu3 %v2289_v35 }
 0x2fd   : > { %1231 = vmatpush.msra.mxu2 %v2278_v31  ;;  %1260 = vmatpush.msra.mxu3 %v2280_v32  ;;  %v1024_v63 = vpop.trf.xlu0 }
 0x2fe   : > { %1837 = vmatmul.msk.f32.gmra.mxu2 %vm1039_vm2, %v1024_v63  ;;  %1841 = vmatmul.msk.f32.gmra.mxu3 %vm1039_vm2, %v1024_v63 }
 0x305   : > { %v1025_v40 = vpop.trf.xlu0 }
 0x306   : > { %1838 = vmatmul.msk.f32.gmra.mxu2 %vm1039_vm2, %v1025_v40  ;;  %1842 = vmatmul.msk.f32.gmra.mxu3 %vm1039_vm2, %v1025_v40 }
 0x30d   : > { %v1026_v37 = vpop.trf.xlu0 }
 0x30e   : > { %1839 = vmatmul.msk.f32.gmra.mxu2 %vm1039_vm2, %v1026_v37  ;;  %1843 = vmatmul.msk.f32.gmra.mxu3 %vm1039_vm2, %v1026_v37 }
 0x316   : > { %1126 = vmatmul.f32.vlgmr.msrb.gmra.mxu2 %v2570_v62  ;;  %1155 = vmatmul.f32.vlgmr.msrb.gmra.mxu3 %v2572_v1 }
 0x317   : > { %1286 = vmatpush.xpose.msrb.mxu2 %v2545_v28  ;;  %1315 = vmatpush.xpose.msrb.mxu3 %v2547_v29 }
 0x31b   : > { %1287 = vmatpush.xpose.msrb.mxu2 %v2541_v22  ;;  %1316 = vmatpush.xpose.msrb.mxu3 %v2543_v23 }
 0x31e   : > { %1129 = vmatmul.f32.gmra.mxu2 %v2604_v56  ;;  %1158 = vmatmul.f32.gmra.mxu3 %v2606_v59  ;;  %v882_v59 = vpop.xlane.xlu1 %881 }
 0x31f   : > { %1288 = vmatpush.xpose.msrb.mxu2 %v2537_v25  ;;  %1317 = vmatpush.xpose.msrb.mxu3 %v2539_v26 }
 0x326   : > { %1132 = vmatmul.f32.gmra.mxu2 %v2587_v7  ;;  %1161 = vmatmul.f32.gmra.mxu3 %v2589_v50  ;;  %v888_v60 = vpop.xlane.xlu1 %887 }
 0x32e   : > { %1135 = vmatmul.f32.gmra.mxu2 %v2618_v47  ;;  %1164 = vmatmul.f32.gmra.mxu3 %v2620_v16  ;;  %v237_v47 = vld [vmem:[%s2913_s1 + $0x140] sm:$0xff] }
 0x32f   : > { %1779 = vmatmul.msk.f32.gmra.mxu0 %vm249_vm1, %v237_v47  ;;  %1828 = vmatmul.msk.f32.gmra.mxu1 %vm249_vm1, %v237_v47  ;;  %v2942_v47 = vld [vmem:[#allocation10_spill] sm:$0xff] }
 0x33d   : > { %v2701_v31 = vpop.xlane.xlu2 %890 }
 0x345   : > { %v2703_v32 = vpop.xlane.xlu2 %893 }
 0x355   : > { %v2705_v34 = vpop.xlane.xlu2 %899 }
 0x35d   : > { %v759_v35 = vpop.xlane.xlu2 %758 }
 0x35e   : > { %v793_v38 = vsub.f32 %v2472_v9, %v759_v35  ;;  %v794_v41 = vsub.f32 %v2474_v10, %v759_v35 }
 0x360   : > { %v849_v25 = vmul.f32 1.442695, %v793_v38  ;;  %v851_v26 = vmul.f32 1.442695, %v794_v41  ;;  %v760_v38 = vmax.f32 %v2481_v14, %v2483_v17 }
 0x362   : > { %1975 = vpow2.f32 %v849_v25 }
 0x363   : > { %1977 = vpow2.f32 %v851_v26 }
 0x364   : > { %1979 = vrcp.f32 %v2631_v61 }
 0x365   : > { %1981 = vrcp.f32 %v882_v59  ;;  %v2941_v59 = vld [vmem:[#allocation9_spill] sm:$0xff] }
 0x366   : > { %1983 = vrcp.f32 %v2633_v21 }
 0x367   : > { %1985 = vrcp.f32 %v888_v60 }
 0x368   : > { %v2709_v22 = vpop.eup %1975 }
 0x369   : > { %v2711_v23 = vpop.eup %1977 }
 0x36a   : > { %v901_v28 = vadd.f32 %v2711_v23, %v2709_v22  ;;  %v1980_v16 = vpop.eup %1979 }
 0x36b   : > { %v933_v51 = vmul.f32 0.17677669, %v1980_v16  ;;  %v1982_v12 = vpop.eup %1981  ;;  %v2943_v16 = vld [vmem:[#allocation7_spill] sm:$0xff] }
 0x36c   : > { %902 = vadd.xlane.f32.xlu0 %v901_v28  ;;  %v934_v43 = vmul.f32 0.17677669, %v1982_v12  ;;  %v1984_v44 = vpop.eup %1983  ;;  %v2940_v28 = vld [vmem:[#allocation11_spill] sm:$0xff]  ;;  %v2947_v12 = vld [vmem:[#allocation22_spill] sm:$0xff] }
 0x36d   : > { %v935_v2 = vmul.f32 0.17677669, %v1984_v44  ;;  %v1986_v0 = vpop.eup %1985 }
 0x36e   : > { %v936_v37 = vmul.f32 0.17677669, %v1986_v0 }
 0x379   : > { %v2715_v29 = vpop.f32.mrf.mxu2  ;;  %v2717_v62 = vpop.f32.mrf.mxu3 }
 0x381   : > { %v2719_v1 = vpop.f32.mrf.mxu2  ;;  %v2721_v9 = vpop.f32.mrf.mxu3 }
 0x389   : > { %v2723_v10 = vpop.f32.mrf.mxu2  ;;  %v2725_v7 = vpop.f32.mrf.mxu3 }
 0x391   : > { %v2728_v50 = vpop.f32.mrf.mxu2  ;;  %v2730_v56 = vpop.f32.mrf.mxu3 }
 0x399   : > { %v1127_v30 = vpop.f32.mrf.mxu2  ;;  %v1156_v48 = vpop.f32.mrf.mxu3 }
 0x39a   : > { %v1157_v54 = vadd.f32 %v1156_v48, %v1127_v30  ;;  %v2944_v30 = vld [vmem:[#allocation8_spill] sm:$0xff]  ;;  %v2945_v48 = vld [vmem:[#allocation5_spill] sm:$0xff] }
 0x39c   : > { %v1168_v61 = vmul.f32 %v1157_v54, %v933_v51  ;;  %v2946_v51 = vld [vmem:[#allocation6_spill] sm:$0xff] }
 0x39e   : > { %1172 = vxpose.xlu1.b32.start [1/4] (short) (narrow) %v1168_v61, 32 }
 0x3a1   : > { %v1130_v42 = vpop.f32.mrf.mxu2  ;;  %v1159_v36 = vpop.f32.mrf.mxu3 }
 0x3a2   : > { %v1160_v53 = vadd.f32 %v1159_v36, %v1130_v42 }
 0x3a4   : > { %v1169_v57 = vmul.f32 %v1160_v53, %v934_v43 }
 0x3a6   : > { %1173 = vxpose.xlu1.b32.cont [2/4] (short) (narrow) %v1169_v57, 32 }
 0x3a9   : > { %v1133_v24 = vpop.f32.mrf.mxu2  ;;  %v1162_v11 = vpop.f32.mrf.mxu3 }
 0x3aa   : > { %v1163_v5 = vadd.f32 %v1162_v11, %v1133_v24  ;;  %v897_v24 = vpop.xlane.xlu0 %896 }
 0x3ac   : > { %v1170_v8 = vmul.f32 %v1163_v5, %v935_v2  ;;  %v536_v41 = vpop.f32.mrf.mxu0  ;;  %v697_v25 = vpop.f32.mrf.mxu1 }
 0x3ad   : > { %1318 = vmatpush.xpose.msrb.mxu3 %v697_v25  ;;  %1289 = vmatpush.xpose.msrb.mxu2 %v536_v41 }
 0x3ae   : > { %1174 = vxpose.xlu1.b32.cont [3/4] (short) (narrow) %v1170_v8, 32 }
 0x3b1   : > { %v1136_v63 = vpop.f32.mrf.mxu2  ;;  %v1165_v40 = vpop.f32.mrf.mxu3 }
 0x3b2   : > { %v1166_v21 = vadd.f32 %v1165_v40, %v1136_v63 }
 0x3b4   : > { %v1171_v35 = vmul.f32 %v1166_v21, %v936_v37 }
 0x3b6   : > { %1175 = vxpose.xlu1.b32.end [4/4] (short) (narrow) %v1171_v35, 32 }
 0x416   : > { %761 = vmax.xlane.f32.xlu1 %v760_v38 }
 0x442   : > { %v1188_v26 = vpop.trf.xlu1 }
 0x443   : > { %1844 = vmatmul.msk.f32.vlgmr.msra.gmra.mxu2 %vm1039_vm2, %v1188_v26  ;;  %1848 = vmatmul.msk.f32.vlgmr.msra.gmra.mxu3 %vm1039_vm2, %v1188_v26 }
 0x444   : > { %1392 = vmatpush.msra.mxu2 %v2341_v52  ;;  %1421 = vmatpush.msra.mxu3 %v2940_v28 }
 0x446   : > { %1393 = vmatpush.msra.mxu2 %v2941_v59  ;;  %1422 = vmatpush.msra.mxu3 %v2942_v47  ;;  %v2949_v47 = vld [vmem:[#allocation21_spill] sm:$0xff] }
 0x448   : > { %1394 = vmatpush.msra.mxu2 %v2943_v16  ;;  %1423 = vmatpush.msra.mxu3 %v2944_v30  ;;  %v2950_v16 = vld [vmem:[#allocation20_spill] sm:$0xff] }
 0x449   : > { %v763_v30 = vmax.f32 %v2950_v16, %v2949_v47 }
 0x44a   : > { %1395 = vmatpush.msra.mxu2 %v2945_v48  ;;  %1424 = vmatpush.msra.mxu3 %v2946_v51  ;;  %v1189_v54 = vpop.trf.xlu1  ;;  %v2952_v51 = vld [vmem:[#allocation19_spill] sm:$0xff] }
 0x44b   : > { %1845 = vmatmul.msk.f32.gmra.mxu2 %vm1039_vm2, %v1189_v54  ;;  %1849 = vmatmul.msk.f32.gmra.mxu3 %vm1039_vm2, %v1189_v54  ;;  %v2953_v54 = vld [vmem:[#allocation16_spill] sm:$0xff] }
 0x452   : > { %v1190_v52 = vpop.trf.xlu1 }
 0x453   : > { %1846 = vmatmul.msk.f32.gmra.mxu2 %vm1039_vm2, %v1190_v52  ;;  %1850 = vmatmul.msk.f32.gmra.mxu3 %vm1039_vm2, %v1190_v52  ;;  %v2954_v52 = vld [vmem:[#allocation17_spill] sm:$0xff] }
 0x45a   : > { %v1191_v61 = vpop.trf.xlu1 }
 0x45b   : > { %1847 = vmatmul.msk.f32.gmra.mxu2 %vm1039_vm2, %v1191_v61  ;;  %1851 = vmatmul.msk.f32.gmra.mxu3 %vm1039_vm2, %v1191_v61  ;;  %v2955_v61 = vld [vmem:[#allocation14_spill] sm:$0xff] }
 0x463   : > { %1290 = vmatmul.f32.vlgmr.msrb.gmra.mxu2 %v2639_v19  ;;  %1319 = vmatmul.f32.vlgmr.msrb.gmra.mxu3 %v2641_v45  ;;  %v2948_v19 = vld [vmem:[#allocation23_spill] sm:$0xff] }
 0x464   : > { %1450 = vmatpush.xpose.msrb.mxu2 %v2598_v27  ;;  %1479 = vmatpush.xpose.msrb.mxu3 %v2600_v6 }
 0x468   : > { %1451 = vmatpush.xpose.msrb.mxu2 %v2576_v46  ;;  %1480 = vmatpush.xpose.msrb.mxu3 %v2581_v33 }
 0x46b   : > { %1293 = vmatmul.f32.gmra.mxu2 %v2647_v39  ;;  %1322 = vmatmul.f32.gmra.mxu3 %v2649_v15 }
 0x46c   : > { %1452 = vmatpush.xpose.msrb.mxu2 %v2557_v13  ;;  %1481 = vmatpush.xpose.msrb.mxu3 %v2559_v4 }
 0x470   : > { %1453 = vmatpush.xpose.msrb.mxu2 %v2947_v12  ;;  %1482 = vmatpush.xpose.msrb.mxu3 %v2948_v19  ;;  %v2956_v12 = vld [vmem:[#allocation15_spill] sm:$0xff]  ;;  %v2957_v19 = vld [vmem:[#allocation12_spill] sm:$0xff] }
 0x473   : > { %1296 = vmatmul.f32.gmra.mxu2 %v2655_v20  ;;  %1325 = vmatmul.f32.gmra.mxu3 %v2657_v3 }
 0x47b   : > { %1299 = vmatmul.f32.gmra.mxu2 %v2661_v49  ;;  %1328 = vmatmul.f32.gmra.mxu3 %v2663_v55 }
 0x489   : > { %v762_v46 = vpop.xlane.xlu1 %761 }
 0x48a   : > { %v795_v33 = vsub.f32 %v2481_v14, %v762_v46  ;;  %v796_v27 = vsub.f32 %v2483_v17, %v762_v46  ;;  %v2958_v46 = vld [vmem:[#allocation13_spill] sm:$0xff] }
 0x48c   : > { %v853_v13 = vmul.f32 1.442695, %v795_v33  ;;  %v855_v6 = vmul.f32 1.442695, %v796_v27 }
 0x48e   : > { %1987 = vpow2.f32 %v853_v13 }
 0x48f   : > { %1989 = vpow2.f32 %v855_v6  ;;  %v768_v6 = vpop.xlane.xlu0 %767 }
 0x490   : > { %1991 = vrcp.f32 %v2701_v31 }
 0x491   : > { %1993 = vrcp.f32 %v2703_v32 }
 0x492   : > { %1995 = vrcp.f32 %v897_v24 }
 0x493   : > { %1997 = vrcp.f32 %v2705_v34  ;;  %v2951_v34 = vld [vmem:[#allocation18_spill] sm:$0xff] }
 0x494   : > { %v2774_v4 = vpop.eup %1987 }
 0x495   : > { %v2776_v45 = vpop.eup %1989 }
 0x496   : > { %v904_v39 = vadd.f32 %v2776_v45, %v2774_v4  ;;  %v1992_v36 = vpop.eup %1991 }
 0x497   : > { %v937_v57 = vmul.f32 0.17677669, %v1992_v36  ;;  %v1994_v11 = vpop.eup %1993 }
 0x498   : > { %905 = vadd.xlane.f32.xlu0 %v904_v39  ;;  %v938_v8 = vmul.f32 0.17677669, %v1994_v11  ;;  %v1996_v63 = vpop.eup %1995 }
 0x499   : > { %v939_v37 = vmul.f32 0.17677669, %v1996_v63  ;;  %v1998_v38 = vpop.eup %1997 }
 0x49a   : > { %v940_v26 = vmul.f32 0.17677669, %v1998_v38 }
 0x4c6   : > { %v2780_v15 = vpop.f32.mrf.mxu2  ;;  %v2782_v20 = vpop.f32.mrf.mxu3 }
 0x4ce   : > { %v2784_v3 = vpop.f32.mrf.mxu2  ;;  %v2786_v14 = vpop.f32.mrf.mxu3 }
 0x4d6   : > { %v2788_v17 = vpop.f32.mrf.mxu2  ;;  %v2790_v49 = vpop.f32.mrf.mxu3 }
 0x4de   : > { %v2793_v55 = vpop.f32.mrf.mxu2  ;;  %v2795_v42 = vpop.f32.mrf.mxu3 }
 0x4e6   : > { %v1291_v43 = vpop.f32.mrf.mxu2  ;;  %v1320_v53 = vpop.f32.mrf.mxu3 }
 0x4e7   : > { %v1321_v60 = vadd.f32 %v1320_v53, %v1291_v43  ;;  %v799_v53 = vsub.f32 %v2501_v58, %v768_v6 }
 0x4e9   : > { %v1332_v44 = vmul.f32 %v1321_v60, %v937_v57 }
 0x4eb   : > { %1336 = vxpose.xlu2.b32.start [1/4] (short) (narrow) %v1332_v44, 32  ;;  %v800_v44 = vsub.f32 %v2503_v18, %v768_v6 }
 0x4ee   : > { %v1294_v2 = vpop.f32.mrf.mxu2  ;;  %v1323_v5 = vpop.f32.mrf.mxu3 }
 0x4ef   : > { %v1324_v31 = vadd.f32 %v1323_v5, %v1294_v2 }
 0x4f1   : > { %v1333_v0 = vmul.f32 %v1324_v31, %v938_v8 }
 0x4f3   : > { %1337 = vxpose.xlu2.b32.cont [2/4] (short) (narrow) %v1333_v0, 32 }
 0x4f6   : > { %v1297_v40 = vpop.f32.mrf.mxu2  ;;  %v1326_v32 = vpop.f32.mrf.mxu3 }
 0x4f7   : > { %v1327_v21 = vadd.f32 %v1326_v32, %v1297_v40  ;;  %v903_v40 = vpop.xlane.xlu0 %902 }
 0x4f9   : > { %v1334_v35 = vmul.f32 %v1327_v21, %v939_v37 }
 0x4fb   : > { %1338 = vxpose.xlu2.b32.cont [3/4] (short) (narrow) %v1334_v35, 32 }
 0x4fe   : > { %v1300_v41 = vpop.f32.mrf.mxu2  ;;  %v1329_v25 = vpop.f32.mrf.mxu3 }
 0x4ff   : > { %v1330_v28 = vadd.f32 %v1329_v25, %v1300_v41 }
 0x501   : > { %v1335_v59 = vmul.f32 %v1330_v28, %v940_v26 }
 0x503   : > { %1339 = vxpose.xlu2.b32.end [4/4] (short) (narrow) %v1335_v59, 32 }
 0x50b   : > { %v906_v21 = vpop.xlane.xlu0 %905 }
 0x574   : > { %764 = vmax.xlane.f32.xlu2 %v763_v30 }
 0x584   : > { %v1352_v48 = vpop.trf.xlu2 }
 0x585   : > { %1852 = vmatmul.msk.f32.vlgmr.msra.gmra.mxu2 %vm1039_vm2, %v1352_v48  ;;  %1856 = vmatmul.msk.f32.vlgmr.msra.gmra.mxu3 %vm1039_vm2, %v1352_v48 }
 0x586   : > { %1556 = vmatpush.msra.mxu2 %v2951_v34  ;;  %1585 = vmatpush.msra.mxu3 %v2952_v51 }
 0x588   : > { %1557 = vmatpush.msra.mxu2 %v2953_v54  ;;  %1586 = vmatpush.msra.mxu3 %v2954_v52 }
 0x58a   : > { %1558 = vmatpush.msra.mxu2 %v2955_v61  ;;  %1587 = vmatpush.msra.mxu3 %v2956_v12 }
 0x58c   : > { %1559 = vmatpush.msra.mxu2 %v2957_v19  ;;  %1588 = vmatpush.msra.mxu3 %v2958_v46  ;;  %v1353_v33 = vpop.trf.xlu2 }
 0x58d   : > { %1853 = vmatmul.msk.f32.gmra.mxu2 %vm1039_vm2, %v1353_v33  ;;  %1857 = vmatmul.msk.f32.gmra.mxu3 %vm1039_vm2, %v1353_v33 }
 0x594   : > { %v1354_v27 = vpop.trf.xlu2 }
 0x595   : > { %1854 = vmatmul.msk.f32.gmra.mxu2 %vm1039_vm2, %v1354_v27  ;;  %1858 = vmatmul.msk.f32.gmra.mxu3 %vm1039_vm2, %v1354_v27 }
 0x59c   : > { %v1355_v13 = vpop.trf.xlu2 }
 0x59d   : > { %1855 = vmatmul.msk.f32.gmra.mxu2 %vm1039_vm2, %v1355_v13  ;;  %1859 = vmatmul.msk.f32.gmra.mxu3 %vm1039_vm2, %v1355_v13 }
 0x5a5   : > { %1454 = vmatmul.f32.vlgmr.msrb.gmra.mxu2 %v2709_v22  ;;  %1483 = vmatmul.f32.vlgmr.msrb.gmra.mxu3 %v2711_v23  ;;  %v861_v22 = vmul.f32 1.442695, %v799_v53  ;;  %v863_v23 = vmul.f32 1.442695, %v800_v44 }
 0x5ad   : > { %1457 = vmatmul.f32.gmra.mxu2 %v2774_v4  ;;  %1486 = vmatmul.f32.gmra.mxu3 %v2776_v45 }
 0x5e7   : > { %v765_v39 = vpop.xlane.xlu2 %764 }
 0x5e8   : > { %v797_v36 = vsub.f32 %v2950_v16, %v765_v39  ;;  %v798_v43 = vsub.f32 %v2949_v47, %v765_v39 }
 0x5ea   : > { %v857_v57 = vmul.f32 1.442695, %v797_v36  ;;  %v859_v60 = vmul.f32 1.442695, %v798_v43 }
 0x5ec   : > { %1999 = vpow2.f32 %v857_v57 }
 0x5ed   : > { %2001 = vpow2.f32 %v859_v60 }
 0x5ee   : > { %2003 = vpow2.f32 %v861_v22 }
 0x5ef   : > { %2005 = vpow2.f32 %v863_v23 }
 0x5f0   : > { %2007 = vrcp.f32 %v903_v40  ;;  %v1603_v40 = vld [vmem:[%s2915_s3] sm:$0xf] }
 0x5f1   : > { %2009 = vrcp.f32 %v906_v21  ;;  %v2079_v21 = vmov 0  }
 0x5f2   : > { %v2000_v24 = vpop.eup %1999  ;;  %1918 = vset.pattern.permute.xlu0 %v2079_v21 }
 0x5f3   : > { %v2002_v4 = vpop.eup %2001  ;;  %1460 = vmatmul.f32.gmra.mxu2 %v2000_v24 }
 0x5f4   : > { %1489 = vmatmul.f32.gmra.mxu3 %v2002_v4  ;;  %v907_v45 = vadd.f32 %v2002_v4, %v2000_v24  ;;  %v2004_v11 = vpop.eup %2003 }
 0x5f5   : > { %v2006_v2 = vpop.eup %2005 }
 0x5f6   : > { %908 = vadd.xlane.f32.xlu0 %v907_v45  ;;  %v910_v58 = vadd.f32 %v2006_v2, %v2004_v11  ;;  %v2008_v35 = vpop.eup %2007 }
 0x5f7   : > { %v941_v25 = vmul.f32 0.17677669, %v2008_v35  ;;  %v2010_v59 = vpop.eup %2009 }
 0x5f8   : > { %v942_v30 = vmul.f32 0.17677669, %v2010_v59 }
 0x5fb   : > { %1463 = vmatmul.f32.gmra.mxu2 %v2004_v11 }
 0x5fc   : > { %1492 = vmatmul.f32.gmra.mxu3 %v2006_v2 }
 0x5fe   : > { %911 = vadd.xlane.f32.xlu0 %v910_v58 }
 0x608   : > { %v2825_v5 = vpop.f32.mrf.mxu2  ;;  %v2827_v18 = vpop.f32.mrf.mxu3 }
 0x610   : > { %v2829_v8 = vpop.f32.mrf.mxu2  ;;  %v2831_v31 = vpop.f32.mrf.mxu3 }
 0x612   : > { %1606 = vperm.xlu0 %1918, %v1603_v40  }
 0x618   : > { %v2833_v0 = vpop.f32.mrf.mxu2  ;;  %v2835_v63 = vpop.f32.mrf.mxu3 }
 0x620   : > { %v2837_v32 = vpop.f32.mrf.mxu2  ;;  %v2839_v37 = vpop.f32.mrf.mxu3 }
 0x628   : > { %v1455_v38 = vpop.f32.mrf.mxu2  ;;  %v1484_v41 = vpop.f32.mrf.mxu3 }
 0x629   : > { %v1485_v26 = vadd.f32 %v1484_v41, %v1455_v38 }
 0x62b   : > { %v1496_v28 = vmul.f32 %v1485_v26, %v941_v25 }
 0x62d   : > { %1500 = vxpose.xlu1.b32.start [1/4] (short) (narrow) %v1496_v28, 32 }
 0x630   : > { %v1458_v47 = vpop.f32.mrf.mxu2  ;;  %v1487_v16 = vpop.f32.mrf.mxu3 }
 0x631   : > { %v1488_v48 = vadd.f32 %v1487_v16, %v1458_v47 }
 0x633   : > { %v1497_v34 = vmul.f32 %v1488_v48, %v942_v30 }
 0x635   : > { %1501 = vxpose.xlu1.b32.cont [2/4] (short) (narrow) %v1497_v34, 32 }
 0x669   : > { %v909_v51 = vpop.xlane.xlu0 %908 }
 0x66a   : > { %2011 = vrcp.f32 %v909_v51 }
 0x670   : > { %v2012_v52 = vpop.eup %2011 }
 0x671   : > { %v912_v54 = vpop.xlane.xlu0 %911  ;;  %v943_v19 = vmul.f32 0.17677669, %v2012_v52 }
 0x672   : > { %2013 = vrcp.f32 %v912_v54 }
 0x676   : > { %v1461_v61 = vpop.f32.mrf.mxu2 }
 0x677   : > { %v1490_v12 = vpop.f32.mrf.mxu3 }
 0x678   : > { %v1491_v46 = vadd.f32 %v1490_v12, %v1461_v61  ;;  %v2014_v27 = vpop.eup %2013 }
 0x679   : > { %v944_v39 = vmul.f32 0.17677669, %v2014_v27 }
 0x67a   : > { %v1498_v33 = vmul.f32 %v1491_v46, %v943_v19 }
 0x67c   : > { %1502 = vxpose.xlu1.b32.cont [3/4] (short) (narrow) %v1498_v33, 32 }
 0x67e   : > { %v1464_v13 = vpop.f32.mrf.mxu2 }
 0x67f   : > { %v1493_v6 = vpop.f32.mrf.mxu3 }
 0x680   : > { %v1494_v36 = vadd.f32 %v1493_v6, %v1464_v13 }
 0x682   : > { %v1499_v43 = vmul.f32 %v1494_v36, %v944_v39 }
 0x684   : > { %1503 = vxpose.xlu1.b32.end [4/4] (short) (narrow) %v1499_v43, 32 }
 0x710   : > { %v1516_v53 = vpop.trf.xlu1 }
 0x711   : > { %1860 = vmatmul.msk.f32.vlgmr.msra.gmra.mxu2 %vm1039_vm2, %v1516_v53  ;;  %1864 = vmatmul.msk.f32.vlgmr.msra.gmra.mxu3 %vm1039_vm2, %v1516_v53 }
 0x718   : > { %v1517_v57 = vpop.trf.xlu1 }
 0x719   : > { %1861 = vmatmul.msk.f32.gmra.mxu2 %vm1039_vm2, %v1517_v57  ;;  %1865 = vmatmul.msk.f32.gmra.mxu3 %vm1039_vm2, %v1517_v57 }
 0x720   : > { %v1518_v60 = vpop.trf.xlu1 }
 0x721   : > { %1862 = vmatmul.msk.f32.gmra.mxu2 %vm1039_vm2, %v1518_v60  ;;  %1866 = vmatmul.msk.f32.gmra.mxu3 %vm1039_vm2, %v1518_v60 }
 0x728   : > { %v1519_v44 = vpop.trf.xlu1 }
 0x729   : > { %1863 = vmatmul.msk.f32.gmra.mxu2 %vm1039_vm2, %v1519_v44  ;;  %1867 = vmatmul.msk.f32.gmra.mxu3 %vm1039_vm2, %v1519_v44 }
 0x794   : > { %v1561_v22 = vpop.f32.mrf.mxu2  ;;  %v1590_v23 = vpop.f32.mrf.mxu3 }
 0x79c   : > { %v1564_v24 = vpop.f32.mrf.mxu2  ;;  %v1593_v4 = vpop.f32.mrf.mxu3 }
 0x7a4   : > { %v1567_v45 = vpop.f32.mrf.mxu2  ;;  %v1596_v11 = vpop.f32.mrf.mxu3 }
 0x7ac   : > { %v1570_v2 = vpop.f32.mrf.mxu2  ;;  %v1599_v58 = vpop.f32.mrf.mxu3 }
 0x7ad   : > { %1609 = vmatpush.msrb.mxu2 %v1570_v2  ;;  %1629 = vmatpush.msrb.mxu3 %v1599_v58 }
 0x7af   : > { %1610 = vmatpush.msrb.mxu2 %v1567_v45  ;;  %1630 = vmatpush.msrb.mxu3 %v1596_v11 }
 0x7b1   : > { %1611 = vmatpush.msrb.mxu2 %v1564_v24  ;;  %1631 = vmatpush.msrb.mxu3 %v1593_v4 }
 0x7b3   : > { %1612 = vmatpush.msrb.mxu2 %v1561_v22  ;;  %1632 = vmatpush.msrb.mxu3 %v1590_v23 }
 0x7b5   : > { %1613 = vmatpush.msrb.mxu2 %v2837_v32  ;;  %1633 = vmatpush.msrb.mxu3 %v2839_v37 }
 0x7b7   : > { %1614 = vmatpush.msrb.mxu2 %v2833_v0  ;;  %1634 = vmatpush.msrb.mxu3 %v2835_v63 }
 0x7b9   : > { %1615 = vmatpush.msrb.mxu2 %v2829_v8  ;;  %1635 = vmatpush.msrb.mxu3 %v2831_v31 }
 0x7bb   : > { %1616 = vmatpush.msrb.mxu2 %v2825_v5  ;;  %1636 = vmatpush.msrb.mxu3 %v2827_v18 }
 0x7bd   : > { %1617 = vmatpush.msrb.mxu2 %v2793_v55  ;;  %1637 = vmatpush.msrb.mxu3 %v2795_v42 }
 0x7bf   : > { %1618 = vmatpush.msrb.mxu2 %v2788_v17  ;;  %1638 = vmatpush.msrb.mxu3 %v2790_v49 }
 0x7c1   : > { %1619 = vmatpush.msrb.mxu2 %v2784_v3  ;;  %1639 = vmatpush.msrb.mxu3 %v2786_v14  ;;  %v1602_v3 = vld [vmem:[%s2914_s2] sm:$0xf] }
 0x7c3   : > { %1620 = vmatpush.msrb.mxu2 %v2780_v15  ;;  %1640 = vmatpush.msrb.mxu3 %v2782_v20 }
 0x7c5   : > { %1621 = vmatpush.msrb.mxu2 %v2728_v50  ;;  %1641 = vmatpush.msrb.mxu3 %v2730_v56 }
 0x7c7   : > { %1622 = vmatpush.msrb.mxu2 %v2723_v10  ;;  %1642 = vmatpush.msrb.mxu3 %v2725_v7  ;;  %v1607_v10 = vpop.permute.xlu0 %1606 }
 0x7c9   : > { %1623 = vmatpush.msrb.mxu2 %v2719_v1  ;;  %1643 = vmatpush.msrb.mxu3 %v2721_v9 }
 0x7cb   : > { %1624 = vmatpush.msrb.mxu2 %v2715_v29  ;;  %1644 = vmatpush.msrb.mxu3 %v2717_v62 }
 0x7cc   : > { %1645 = vmatmul.f32.vlgmr.msrb.gmra.mxu3 %v1602_v3  ;;  %1625 = vmatmul.f32.vlgmr.msrb.gmra.mxu2 %v1602_v3 }
 0x84f   : > { %v1646_v1 = vpop.f32.mrf.mxu3  ;;  %v1626_v9 = vpop.f32.mrf.mxu2 }
 0x850   : > { %v1647_v7 = vadd.f32 %v1646_v1, %v1607_v10  ;;  %v1627_v50 = vadd.f32 %v1626_v9, %v1607_v10 }
 0x852   : > { %v1651_v29 = vrot.slane %v1647_v7, 4 }
 0x854   : > { %v1652_v62 = vsel %vm394_vm0, %v1627_v50, %v1651_v29 }
 0x855   : > { %1654 = vst [vmem:[%s190_s10] sm:$0xff] %v1652_v62 }
 0x856   : > { %2042 = shalt.err (!%p2039_p3)
}
 0x857   : > { %1877 = dma.vmem_to_hbm [thread:$0]  (%p2143_p5), %s1670_s11, 128, %s1672_s12, %s1656_s19  }
 0x858 PF: > { %p1883_p4 = scmp.ge.s32.totalorder %s2077_s18, 2  ;;  %s1683_s29 = sand.u32 1, %s2065_s15  }
 0x859   : > { %s1684_s30 = scalar_lea.sflag [#allocation3], %s1683_s29 }
 0x85a   : > { %p1880_p7 = pnand %p1883_p4, %p2147_p6 }
 0x85c   : > { %p1881_p8 = pneg %p1880_p7 }
 0x85e   : > { %2060 = dma.done.wait (%p1881_p8), %s1684_s30, 128  }
 0x85f   : > { %2062 = vsyncadd (%p1881_p8), %s1684_s30, 4294967168  ;;  %p14_p9 = scmp.ge.s32.totalorder %s2130_s21, 4   ;;  %s2959_s15 = smov %s2069_s16 }
 0x860   : > { %s2960_s16 = smov %s2073_s17  ;;  %s2961_s17 = smov %s2141_s24 }
 0x861   : > { %s2962_s18 = smov %s2130_s21  ;;  %16 = sbr.rel (!%p14_p9) target bundleno = 3 (0x3), region = 71 }
 0x866   :  { %1690 = vsyncpa [#allocation3], 1 }
 0x867   :  { %1692 = vsyncpa [#allocation3 + $0x1], 1 }

</bundles_post_ra>
